<compile_context>
chip_gen: v5e
topology: v5e:2x2
jax: 0.10.0
libtpu: 0.0.40
codegen_flags: <defaults>
</compile_context>

<pallas_src>
import functools
import jax
import jax.numpy as jnp
from jax import lax
from jax.experimental import pallas as pl
from jax.experimental.pallas import tpu as pltpu


_VMEM_TILE_BYTES = 2 * 1024 * 1024  # per-operand main-block budget (conservative)


def _largest_divisor_leq(n, cap):
    cap = max(1, min(n, cap))
    for d in range(cap, 0, -1):
        if n % d == 0:
            return d
    return 1


# ---------------------------------------------------------------------------
# Kernel 1: fused 1x1 conv + ConvTranspose2d(k, stride=k)  (upsample branch)
# ---------------------------------------------------------------------------
def _make_proj_upsample_kernel(Rt, W, Cin, Cmid, k):
    kC = k * Cmid

    def kernel(x_ref, w1_ref, b1_ref, wup_ref, bup_ref, o_ref):
        x = x_ref[0].reshape(Rt * W, Cin)
        # 1x1 projection (stays in registers / VMEM)
        h = jnp.dot(x, w1_ref[...], preferred_element_type=jnp.float32) + b1_ref[...]
        # transposed conv: one matmul per output sub-row di, written directly
        # to its final (strided) location via the 5-D out block.
        for di in range(k):
            z = jnp.dot(h, wup_ref[di], preferred_element_type=jnp.float32) + bup_ref[...]
            o_ref[0, :, di, :, :] = z.reshape(Rt, W, kC).astype(o_ref.dtype)

    return kernel


def fused_project_upsample(x, w1, b1, w_up, b_up, k):
    """x: (B,H,W,Cin) NHWC -> (B, H*k, W*k, Cmid) NHWC, one pallas_call."""
    B, H, W, Cin = x.shape
    Cmid = w1.shape[0]

    # pack weights once (tiny, wrapper side)
    w1f = jnp.transpose(w1.reshape(Cmid, Cin), (1, 0))                    # (Cin, Cmid)
    b1f = b1.reshape(1, Cmid)
    # wupf[di][ci, dj*Cmid + co] = w_up[ci, co, di, dj]
    wupf = jnp.transpose(w_up, (2, 0, 3, 1)).reshape(k, Cmid, k * Cmid)
    bupf = jnp.tile(b_up, (k,)).reshape(1, k * Cmid)

    bytes_per_row = W * max(Cin, k * k * Cmid) * 4
    Rt = _largest_divisor_leq(H, max(1, _VMEM_TILE_BYTES // max(1, bytes_per_row)))
    grid = (B, H // Rt)

    out5 = pl.pallas_call(
        _make_proj_upsample_kernel(Rt, W, Cin, Cmid, k),
        out_shape=jax.ShapeDtypeStruct((B, H, k, W, k * Cmid), jnp.float32),
        grid=grid,
        in_specs=[
            pl.BlockSpec((1, Rt, W, Cin), lambda b, i: (b, i, 0, 0)),
            pl.BlockSpec((Cin, Cmid), lambda b, i: (0, 0)),
            pl.BlockSpec((1, Cmid), lambda b, i: (0, 0)),
            pl.BlockSpec((k, Cmid, k * Cmid), lambda b, i: (0, 0, 0)),
            pl.BlockSpec((1, k * Cmid), lambda b, i: (0, 0)),
        ],
        out_specs=pl.BlockSpec((1, Rt, k, W, k * Cmid),
                               lambda b, i: (b, i, 0, 0, 0)),
        compiler_params=pltpu.CompilerParams(
            dimension_semantics=("parallel", "parallel")),
    )(x, w1f, b1f, wupf, bupf)
    # (B,H,k,W,k*Cmid) -> (B,H*k,W*k,Cmid) is a contiguous (free) reshape.
    return out5.reshape(B, H * k, W * k, Cmid)


# ---------------------------------------------------------------------------
# Kernel 2: 3x3 conv (pad=1, stride s), optional fused leading 1x1 conv,
#           optional bias; in-kernel im2col on a halo'd VMEM tile.
# ---------------------------------------------------------------------------
def _make_conv3x3_kernel(*, s, Rb, Hu, Wu, H_out, W_out, Wpad,
                         Cin_raw, Cmid, Cout, fuse_1x1, has_bias):
    Rtot = Rb * s + 2
    M_take = min(Rb * s, (Rb - 1) * s + 2)
    need_bot = ((Rb - 1) * s + 2) > Rb * s           # only when s == 1
    ncols = min(Wu, Wpad - 1)
    right_margin = Wpad - 1 - ncols
    apply_main_mask = ((H_out - Rb) * s + M_take - 1) >= Hu

    def kernel(*refs):
        it = iter(refs)
        xm_ref = next(it)          # main rows         (1, Rb*s, Wu, Cin_raw)
        xt_ref = next(it)          # top halo row       (1, 1,   Wu, Cin_raw)
        xb_ref = next(it)          # bottom halo row    (1, 1,   Wu, Cin_raw)
        if fuse_1x1:
            w1_ref = next(it)
            b1_ref = next(it)
        w_ref = next(it)           # (3, 3, Cmid, Cout)
        if has_bias:
            bias_ref = next(it)    # (1, Cout)
        o_ref = next(it)           # (1, Rb, W_out, Cout)
        xs_ref = next(it)          # VMEM scratch (Rtot, Wpad, Cmid) f32

        i = pl.program_id(1)
        r0 = i * Rb * s

        def project(v):
            # v: (n, ncols, Cin_raw) -> (n, ncols, Cmid) float32
            n = v.shape[0]
            v = v.astype(jnp.float32)
            if fuse_1x1:
                h = jnp.dot(v.reshape(n * ncols, Cin_raw), w1_ref[...],
                            preferred_element_type=jnp.float32) + b1_ref[...]
                return h.reshape(n, ncols, Cmid)
            return v

        # ---- assemble zero-padded (Rtot, Wpad, Cmid) tile in VMEM ----------
        xs_ref[:, 0:1, :] = jnp.zeros((Rtot, 1, Cmid), jnp.float32)
        if right_margin > 0:
            xs_ref[:, 1 + ncols:, :] = jnp.zeros((Rtot, right_margin, Cmid),
                                                 jnp.float32)

        top = project(xt_ref[0][:, :ncols, :])                       # (1,ncols,Cmid)
        xs_ref[0:1, 1:1 + ncols, :] = top * (i > 0).astype(jnp.float32)

        main = project(xm_ref[0][:M_take, :ncols, :])                # (M_take,ncols,Cmid)
        if apply_main_mask:
            ridx = r0 + lax.broadcasted_iota(jnp.int32, (M_take, 1), 0)
            main = jnp.where((ridx < Hu)[:, :, None], main, 0.0)
        xs_ref[1:1 + M_take, 1:1 + ncols, :] = main

        if need_bot:
            bot = project(xb_ref[0][:, :ncols, :])                   # (1,ncols,Cmid)
            valid_bot = ((r0 + Rb * s) < Hu).astype(jnp.float32)
            xs_ref[1 + M_take:2 + M_take, 1:1 + ncols, :] = bot * valid_bot

        # ---- 9 shifted taps, f32 accumulation (in-kernel im2col) -----------
        acc = jnp.zeros((Rb * W_out, Cout), jnp.float32)
        for kw in range(3):
            if s == 1:
                cols = xs_ref[:, kw:kw + W_out, :]                   # (Rtot,W_out,Cmid)
            else:
                cols = xs_ref[:, pl.ds(kw, W_out, stride=s), :]
            for kh in range(3):
                rows = cols[kh:kh + Rb * s]                          # (Rb*s,W_out,Cmid)
                if s > 1:
                    rows = rows.reshape(Rb, s, W_out, Cmid)[:, 0]
                acc = acc + jnp.dot(rows.reshape(Rb * W_out, Cmid),
                                    w_ref[kh, kw],
                                    preferred_element_type=jnp.float32)
        if has_bias:
            acc = acc + bias_ref[...]
        o_ref[0] = acc.reshape(Rb, W_out, Cout).astype(o_ref.dtype)

    return kernel


def conv3x3(x, w_oihw, bias, *, stride=1, proj=None):
    """3x3 conv, padding=1, stride s, NHWC in/out via one pallas_call.
    If proj=(w1, b1), a 1x1 conv (Cin_raw -> Cmid) is fused in front."""
    B, Hu, Wu, Cin_raw = x.shape
    s = int(stride)
    Cout = w_oihw.shape[0]
    if proj is not None:
        w1, b1 = proj
        Cmid = w1.shape[0]
    else:
        Cmid = Cin_raw
    assert w_oihw.shape[1] == Cmid
    H_out = (Hu + 2 - 3) // s + 1
    W_out = (Wu + 2 - 3) // s + 1
    Wpad = W_out * s + 2

    bytes_per_out_row = s * Wu * max(Cin_raw, Cmid) * 4
    Rb = _largest_divisor_leq(
        H_out, max(1, _VMEM_TILE_BYTES // max(1, bytes_per_out_row)))
    n_blk = H_out // Rb

    wf = jnp.transpose(w_oihw, (2, 3, 1, 0))               # (3,3,Cmid,Cout)
    has_bias = bias is not None

    kernel = _make_conv3x3_kernel(
        s=s, Rb=Rb, Hu=Hu, Wu=Wu, H_out=H_out, W_out=W_out, Wpad=Wpad,
        Cin_raw=Cin_raw, Cmid=Cmid, Cout=Cout,
        fuse_1x1=proj is not None, has_bias=has_bias)

    in_specs = [
        # main rows of the (unpadded) input for this output row block
        pl.BlockSpec((1, Rb * s, Wu, Cin_raw), lambda b, i: (b, i, 0, 0)),
        # single-row top halo (index clamped; zeroed in-kernel at the border)
        pl.BlockSpec((1, 1, Wu, Cin_raw),
                     lambda b, i: (b, jnp.maximum(i * (Rb * s) - 1, 0), 0, 0)),
        # single-row bottom halo (index clamped; zeroed in-kernel at the border)
        pl.BlockSpec((1, 1, Wu, Cin_raw),
                     lambda b, i: (b, jnp.minimum((i + 1) * (Rb * s), Hu - 1), 0, 0)),
    ]
    args = [x, x, x]
    if proj is not None:
        w1f = jnp.transpose(w1.reshape(Cmid, Cin_raw), (1, 0))
        b1f = b1.reshape(1, Cmid)
        in_specs += [pl.BlockSpec((Cin_raw, Cmid), lambda b, i: (0, 0)),
                     pl.BlockSpec((1, Cmid), lambda b, i: (0, 0))]
        args += [w1f, b1f]
    in_specs += [pl.BlockSpec((3, 3, Cmid, Cout), lambda b, i: (0, 0, 0, 0))]
    args += [wf]
    if has_bias:
        in_specs += [pl.BlockSpec((1, Cout), lambda b, i: (0, 0))]
        args += [bias.reshape(1, Cout)]

    return pl.pallas_call(
        kernel,
        out_shape=jax.ShapeDtypeStruct((B, H_out, W_out, Cout), jnp.float32),
        grid=(B, n_blk),
        in_specs=in_specs,
        out_specs=pl.BlockSpec((1, Rb, W_out, Cout), lambda b, i: (b, i, 0, 0)),
        scratch_shapes=[pltpu.VMEM((Rb * s + 2, Wpad, Cmid), jnp.float32)],
        compiler_params=pltpu.CompilerParams(
            dimension_semantics=("parallel", "parallel")),
    )(*args)


# ---------------------------------------------------------------------------
# ReassembleBlock: params + forward.
# ---------------------------------------------------------------------------
def init_params(key, in_channels, mid_channels, out_channels, upsample_factor):
    k1, k2, k3, k4, k5 = jax.random.split(key, 5)
    scale = 0.05
    p = {
        "w1": scale * jax.random.normal(k1, (mid_channels, in_channels, 1, 1), jnp.float32),
        "b1": scale * jax.random.normal(k2, (mid_channels,), jnp.float32),
        "w2": scale * jax.random.normal(k3, (out_channels, mid_channels, 3, 3), jnp.float32),
    }
    if upsample_factor > 1.0:
        k = int(upsample_factor)
        p["w_up"] = scale * jax.random.normal(k4, (mid_channels, mid_channels, k, k), jnp.float32)
        p["b_up"] = scale * jax.random.normal(k5, (mid_channels,), jnp.float32)
    elif upsample_factor < 1.0:
        p["w_up"] = scale * jax.random.normal(k4, (mid_channels, mid_channels, 3, 3), jnp.float32)
        p["b_up"] = scale * jax.random.normal(k5, (mid_channels,), jnp.float32)
    return p


def reassemble_forward(params, x_nchw, upsample_factor):
    """Forward of ReassembleBlock. x_nchw: (B,Cin,H,W) f32 -> (B,Cout,H',W')."""
    x = jnp.transpose(x_nchw, (0, 2, 3, 1))                 # NCHW -> NHWC
    if upsample_factor > 1.0:
        k = int(upsample_factor)
        y = fused_project_upsample(x, params["w1"], params["b1"],
                                   params["w_up"], params["b_up"], k)
        y = conv3x3(y, params["w2"], None, stride=1)
    elif upsample_factor == 1.0:
        # whole block in ONE pallas_call: 1x1 fused into the 3x3
        y = conv3x3(x, params["w2"], None, stride=1,
                    proj=(params["w1"], params["b1"]))
    else:
        s = int(round(1.0 / upsample_factor))
        y = conv3x3(x, params["w_up"], params["b_up"], stride=s,
                    proj=(params["w1"], params["b1"]))
        y = conv3x3(y, params["w2"], None, stride=1)
    return jnp.transpose(y, (0, 3, 1, 2))                   # NHWC -> NCHW


# ---------------------------------------------------------------------------
# Pure-lax reference (for correctness check only).
# ---------------------------------------------------------------------------
def reference_forward(params, x, upsample_factor):
    dn = ("NCHW", "OIHW", "NCHW")
    hp = lax.Precision.HIGHEST
    y = lax.conv_general_dilated(x, params["w1"], (1, 1), "VALID",
                                 dimension_numbers=dn, precision=hp)
    y = y + params["b1"][None, :, None, None]
    if upsample_factor > 1.0:
        k = int(upsample_factor)
        w_flip = jnp.transpose(params["w_up"], (1, 0, 2, 3))[:, :, ::-1, ::-1]
        y = lax.conv_general_dilated(y, w_flip, (1, 1), ((k - 1, k - 1), (k - 1, k - 1)),
                                     lhs_dilation=(k, k), dimension_numbers=dn,
                                     precision=hp)
        y = y + params["b_up"][None, :, None, None]
    elif upsample_factor == 1.0:
        pass
    else:
        s = int(round(1.0 / upsample_factor))
        y = lax.conv_general_dilated(y, params["w_up"], (s, s), ((1, 1), (1, 1)),
                                     dimension_numbers=dn, precision=hp)
        y = y + params["b_up"][None, :, None, None]
    y = lax.conv_general_dilated(y, params["w2"], (1, 1), ((1, 1), (1, 1)),
                                 dimension_numbers=dn, precision=hp)
    return y


if __name__ == "__main__":
    key = jax.random.PRNGKey(0)
    kx, kp = jax.random.split(key)

    B, Cin, H, W = 2, 32, 8, 8
    mid_channels, out_channels = 16, 24
    x = jax.random.normal(kx, (B, Cin, H, W), jnp.float32)

    ok = True
    for upsample_factor in (2.0, 1.0, 0.5):   # exercise all three branches
        params = init_params(kp, Cin, mid_channels, out_channels, upsample_factor)
        fwd = jax.jit(functools.partial(reassemble_forward,
                                        upsample_factor=upsample_factor))
        out = jax.block_until_ready(fwd(params, x))
        ref = jax.block_until_ready(reference_forward(params, x, upsample_factor))
        if out.shape != ref.shape or not bool(jnp.allclose(out, ref, atol=1e-3, rtol=1e-3)):
            ok = False
            print(f"MISMATCH at upsample_factor={upsample_factor}: "
                  f"{out.shape} vs {ref.shape}, "
                  f"max_err={float(jnp.max(jnp.abs(out - ref)))}")

    if ok:
        print("KERNEL_OK")
</pallas_src>

<mosaic_0001>
module attributes {stable_mosaic.version = 11 : i64} {
  func.func @kernel(%arg0: i32, %arg1: i32, %arg2: memref<1x8x8x32xf32, #tpu.memory_space<vmem>>, %arg3: memref<32x16xf32, #tpu.memory_space<vmem>>, %arg4: memref<1x16xf32, #tpu.memory_space<vmem>>, %arg5: memref<2x16x32xf32, #tpu.memory_space<vmem>>, %arg6: memref<1x32xf32, #tpu.memory_space<vmem>>, %arg7: memref<1x8x2x8x32xf32, #tpu.memory_space<vmem>>) attributes {dimension_semantics = [#tpu.dimension_semantics<parallel>, #tpu.dimension_semantics<parallel>], iteration_bounds = array<i64: 2, 1>, scalar_prefetch = 0 : i64, scratch_operands = 0 : i64, tpu.core_type = #tpu.core_type<tc>, window_params = [{transform_indices = @transform_0, window_bounds = array<i64: 1, 8, 8, 32>}, {pipeline_mode = #tpu.pipeline_mode<synchronous>, transform_indices = @transform_1, window_bounds = array<i64: 32, 16>}, {pipeline_mode = #tpu.pipeline_mode<synchronous>, transform_indices = @transform_2, window_bounds = array<i64: 1, 16>}, {pipeline_mode = #tpu.pipeline_mode<synchronous>, transform_indices = @transform_3, window_bounds = array<i64: 2, 16, 32>}, {pipeline_mode = #tpu.pipeline_mode<synchronous>, transform_indices = @transform_4, window_bounds = array<i64: 1, 32>}, {transform_indices = @transform_5, window_bounds = array<i64: 1, 8, 2, 8, 32>}]} {
    %c0 = arith.constant 0 : index
    %c0_0 = arith.constant 0 : index
    %c0_1 = arith.constant 0 : index
    %c0_2 = arith.constant 0 : index
    %0 = vector.load %arg2[%c0, %c0_0, %c0_1, %c0_2] : memref<1x8x8x32xf32, #tpu.memory_space<vmem>>, vector<1x8x8x32xf32>
    %1 = vector.shape_cast %0 : vector<1x8x8x32xf32> to vector<8x8x32xf32>
    %2 = vector.shape_cast %1 : vector<8x8x32xf32> to vector<64x32xf32>
    %c0_3 = arith.constant 0 : index
    %c0_4 = arith.constant 0 : index
    %3 = vector.load %arg3[%c0_3, %c0_4] : memref<32x16xf32, #tpu.memory_space<vmem>>, vector<32x16xf32>
    %cst = arith.constant dense<0.000000e+00> : vector<64x16xf32>
    %4 = tpu.matmul %2, %3, %cst {dimension_numbers = #tpu.dot_dimension_numbers<[1], [0], [0], [1], [0, 0, 1, 1], [], []>} : vector<64x32xf32>, vector<32x16xf32>, vector<64x16xf32> -> vector<64x16xf32>
    %c0_5 = arith.constant 0 : index
    %c0_6 = arith.constant 0 : index
    %5 = vector.load %arg4[%c0_5, %c0_6] : memref<1x16xf32, #tpu.memory_space<vmem>>, vector<1x16xf32>
    %6 = vector.broadcast %5 : vector<1x16xf32> to vector<64x16xf32>
    %7 = arith.addf %4, %6 : vector<64x16xf32>
    %c0_7 = arith.constant 0 : index
    %c0_8 = arith.constant 0 : index
    %c0_9 = arith.constant 0 : index
    %8 = vector.load %arg5[%c0_7, %c0_8, %c0_9] : memref<2x16x32xf32, #tpu.memory_space<vmem>>, vector<1x16x32xf32>
    %9 = vector.shape_cast %8 : vector<1x16x32xf32> to vector<16x32xf32>
    %cst_10 = arith.constant dense<0.000000e+00> : vector<64x32xf32>
    %10 = tpu.matmul %7, %9, %cst_10 {dimension_numbers = #tpu.dot_dimension_numbers<[1], [0], [0], [1], [0, 0, 1, 1], [], []>} : vector<64x16xf32>, vector<16x32xf32>, vector<64x32xf32> -> vector<64x32xf32>
    %c0_11 = arith.constant 0 : index
    %c0_12 = arith.constant 0 : index
    %11 = vector.load %arg6[%c0_11, %c0_12] : memref<1x32xf32, #tpu.memory_space<vmem>>, vector<1x32xf32>
    %12 = vector.broadcast %11 : vector<1x32xf32> to vector<64x32xf32>
    %13 = arith.addf %10, %12 : vector<64x32xf32>
    %14 = vector.shape_cast %13 : vector<64x32xf32> to vector<8x8x32xf32>
    %c0_13 = arith.constant 0 : index
    %c0_14 = arith.constant 0 : index
    %c0_15 = arith.constant 0 : index
    %c0_16 = arith.constant 0 : index
    %c0_17 = arith.constant 0 : index
    %15 = vector.load %arg7[%c0_13, %c0_14, %c0_15, %c0_16, %c0_17] : memref<1x8x2x8x32xf32, #tpu.memory_space<vmem>>, vector<1x8x1x8x32xf32>
    %16 = vector.shape_cast %15 : vector<1x8x1x8x32xf32> to vector<8x8x32xf32>
    %17 = vector.shape_cast %14 : vector<8x8x32xf32> to vector<1x8x1x8x32xf32>
    tpu.vector_store %arg7[%c0_13, %c0_14, %c0_15, %c0_16, %c0_17], %17 {strides = array<i32>} : memref<1x8x2x8x32xf32, #tpu.memory_space<vmem>>, vector<1x8x1x8x32xf32>,
    %c1 = arith.constant 1 : index
    %c0_18 = arith.constant 0 : index
    %c0_19 = arith.constant 0 : index
    %18 = vector.load %arg5[%c1, %c0_18, %c0_19] : memref<2x16x32xf32, #tpu.memory_space<vmem>>, vector<1x16x32xf32>
    %19 = vector.shape_cast %18 : vector<1x16x32xf32> to vector<16x32xf32>
    %cst_20 = arith.constant dense<0.000000e+00> : vector<64x32xf32>
    %20 = tpu.matmul %7, %19, %cst_20 {dimension_numbers = #tpu.dot_dimension_numbers<[1], [0], [0], [1], [0, 0, 1, 1], [], []>} : vector<64x16xf32>, vector<16x32xf32>, vector<64x32xf32> -> vector<64x32xf32>
    %c0_21 = arith.constant 0 : index
    %c0_22 = arith.constant 0 : index
    %21 = vector.load %arg6[%c0_21, %c0_22] : memref<1x32xf32, #tpu.memory_space<vmem>>, vector<1x32xf32>
    %22 = vector.broadcast %21 : vector<1x32xf32> to vector<64x32xf32>
    %23 = arith.addf %20, %22 : vector<64x32xf32>
    %24 = vector.shape_cast %23 : vector<64x32xf32> to vector<8x8x32xf32>
    %c0_23 = arith.constant 0 : index
    %c0_24 = arith.constant 0 : index
    %c1_25 = arith.constant 1 : index
    %c0_26 = arith.constant 0 : index
    %c0_27 = arith.constant 0 : index
    %25 = vector.load %arg7[%c0_23, %c0_24, %c1_25, %c0_26, %c0_27] : memref<1x8x2x8x32xf32, #tpu.memory_space<vmem>>, vector<1x8x1x8x32xf32>
    %26 = vector.shape_cast %25 : vector<1x8x1x8x32xf32> to vector<8x8x32xf32>
    %27 = vector.shape_cast %24 : vector<8x8x32xf32> to vector<1x8x1x8x32xf32>
    tpu.vector_store %arg7[%c0_23, %c0_24, %c1_25, %c0_26, %c0_27], %27 {strides = array<i32>} : memref<1x8x2x8x32xf32, #tpu.memory_space<vmem>>, vector<1x8x1x8x32xf32>,
    return
  }
  func.func @transform_0(%arg0: i32, %arg1: i32) -> (i32, i32, i32, i32) {
    %c0_i32 = arith.constant 0 : i32
    %c0_i32_0 = arith.constant 0 : i32
    %c0_i32_1 = arith.constant 0 : i32
    return %arg0, %arg1, %c0_i32, %c0_i32_0 : i32, i32, i32, i32
  }
  func.func @transform_1(%arg0: i32, %arg1: i32) -> (i32, i32) {
    %c0_i32 = arith.constant 0 : i32
    %c0_i32_0 = arith.constant 0 : i32
    %c0_i32_1 = arith.constant 0 : i32
    return %c0_i32, %c0_i32_0 : i32, i32
  }
  func.func @transform_2(%arg0: i32, %arg1: i32) -> (i32, i32) {
    %c0_i32 = arith.constant 0 : i32
    %c0_i32_0 = arith.constant 0 : i32
    %c0_i32_1 = arith.constant 0 : i32
    return %c0_i32, %c0_i32_0 : i32, i32
  }
  func.func @transform_3(%arg0: i32, %arg1: i32) -> (i32, i32, i32) {
    %c0_i32 = arith.constant 0 : i32
    %c0_i32_0 = arith.constant 0 : i32
    %c0_i32_1 = arith.constant 0 : i32
    %c0_i32_2 = arith.constant 0 : i32
    return %c0_i32, %c0_i32_0, %c0_i32_1 : i32, i32, i32
  }
  func.func @transform_4(%arg0: i32, %arg1: i32) -> (i32, i32) {
    %c0_i32 = arith.constant 0 : i32
    %c0_i32_0 = arith.constant 0 : i32
    %c0_i32_1 = arith.constant 0 : i32
    return %c0_i32, %c0_i32_0 : i32, i32
  }
  func.func @transform_5(%arg0: i32, %arg1: i32) -> (i32, i32, i32, i32, i32) {
    %c0_i32 = arith.constant 0 : i32
    %c0_i32_0 = arith.constant 0 : i32
    %c0_i32_1 = arith.constant 0 : i32
    %c0_i32_2 = arith.constant 0 : i32
    return %arg0, %arg1, %c0_i32, %c0_i32_0, %c0_i32_1 : i32, i32, i32, i32, i32
  }
}

module attributes {stable_mosaic.version = 11 : i64} {
  func.func @kernel(%arg0: i32, %arg1: i32, %arg2: memref<1x16x16x16xf32, #tpu.memory_space<vmem>>, %arg3: memref<1x1x16x16xf32, #tpu.memory_space<vmem>>, %arg4: memref<1x1x16x16xf32, #tpu.memory_space<vmem>>, %arg5: memref<3x3x16x24xf32, #tpu.memory_space<vmem>>, %arg6: memref<1x16x16x24xf32, #tpu.memory_space<vmem>>, %arg7: memref<18x18x16xf32, #tpu.memory_space<vmem>>) attributes {dimension_semantics = [#tpu.dimension_semantics<parallel>, #tpu.dimension_semantics<parallel>], iteration_bounds = array<i64: 2, 1>, scalar_prefetch = 0 : i64, scratch_operands = 1 : i64, tpu.core_type = #tpu.core_type<tc>, window_params = [{transform_indices = @transform_0, window_bounds = array<i64: 1, 16, 16, 16>}, {transform_indices = @transform_1, window_bounds = array<i64: 1, 1, 16, 16>}, {transform_indices = @transform_2, window_bounds = array<i64: 1, 1, 16, 16>}, {pipeline_mode = #tpu.pipeline_mode<synchronous>, transform_indices = @transform_3, window_bounds = array<i64: 3, 3, 16, 24>}, {transform_indices = @transform_4, window_bounds = array<i64: 1, 16, 16, 24>}]} {
    %c16_i32 = arith.constant 16 : i32
    %0 = arith.muli %arg1, %c16_i32 : i32
    %c1_i32 = arith.constant 1 : i32
    %1 = arith.muli %0, %c1_i32 : i32
    %cst = arith.constant 0.000000e+00 : f32
    %2 = vector.broadcast %cst : f32 to vector<18x1x16xf32>
    %c0 = arith.constant 0 : index
    %c0_0 = arith.constant 0 : index
    %c0_1 = arith.constant 0 : index
    %3 = vector.load %arg7[%c0, %c0_0, %c0_1] : memref<18x18x16xf32, #tpu.memory_space<vmem>>, vector<18x1x16xf32>
    tpu.vector_store %arg7[%c0, %c0_0, %c0_1], %2 {strides = array<i32>} : memref<18x18x16xf32, #tpu.memory_space<vmem>>, vector<18x1x16xf32>,
    %cst_2 = arith.constant 0.000000e+00 : f32
    %4 = vector.broadcast %cst_2 : f32 to vector<18x1x16xf32>
    %c0_3 = arith.constant 0 : index
    %c17 = arith.constant 17 : index
    %c0_4 = arith.constant 0 : index
    %5 = vector.load %arg7[%c0_3, %c17, %c0_4] : memref<18x18x16xf32, #tpu.memory_space<vmem>>, vector<18x1x16xf32>
    tpu.vector_store %arg7[%c0_3, %c17, %c0_4], %4 {strides = array<i32>} : memref<18x18x16xf32, #tpu.memory_space<vmem>>, vector<18x1x16xf32>,
    %c0_5 = arith.constant 0 : index
    %c0_6 = arith.constant 0 : index
    %c0_7 = arith.constant 0 : index
    %c0_8 = arith.constant 0 : index
    %6 = vector.load %arg3[%c0_5, %c0_6, %c0_7, %c0_8] : memref<1x1x16x16xf32, #tpu.memory_space<vmem>>, vector<1x1x16x16xf32>
    %7 = vector.shape_cast %6 : vector<1x1x16x16xf32> to vector<1x16x16xf32>
    %c0_i32 = arith.constant 0 : i32
    %8 = arith.cmpi sgt, %arg1, %c0_i32 : i32
    %9 = arith.extui %8 : i1 to i32
    %10 = arith.sitofp %9 : i32 to f32
    %11 = vector.broadcast %10 : f32 to vector<1x16x16xf32>
    %12 = arith.mulf %7, %11 : vector<1x16x16xf32>
    %c0_9 = arith.constant 0 : index
    %c1 = arith.constant 1 : index
    %c0_10 = arith.constant 0 : index
    %13 = vector.load %arg7[%c0_9, %c1, %c0_10] : memref<18x18x16xf32, #tpu.memory_space<vmem>>, vector<1x16x16xf32>
    tpu.vector_store %arg7[%c0_9, %c1, %c0_10], %12 {strides = array<i32>} : memref<18x18x16xf32, #tpu.memory_space<vmem>>, vector<1x16x16xf32>,
    %c0_11 = arith.constant 0 : index
    %c0_12 = arith.constant 0 : index
    %c0_13 = arith.constant 0 : index
    %c0_14 = arith.constant 0 : index
    %14 = vector.load %arg2[%c0_11, %c0_12, %c0_13, %c0_14] : memref<1x16x16x16xf32, #tpu.memory_space<vmem>>, vector<1x16x16x16xf32>
    %15 = vector.shape_cast %14 : vector<1x16x16x16xf32> to vector<16x16x16xf32>
    %c1_15 = arith.constant 1 : index
    %c1_16 = arith.constant 1 : index
    %c0_17 = arith.constant 0 : index
    %16 = vector.load %arg7[%c1_15, %c1_16, %c0_17] : memref<18x18x16xf32, #tpu.memory_space<vmem>>, vector<16x16x16xf32>
    tpu.vector_store %arg7[%c1_15, %c1_16, %c0_17], %15 {strides = array<i32>} : memref<18x18x16xf32, #tpu.memory_space<vmem>>, vector<16x16x16xf32>,
    %c0_18 = arith.constant 0 : index
    %c0_19 = arith.constant 0 : index
    %c0_20 = arith.constant 0 : index
    %c0_21 = arith.constant 0 : index
    %17 = vector.load %arg4[%c0_18, %c0_19, %c0_20, %c0_21] : memref<1x1x16x16xf32, #tpu.memory_space<vmem>>, vector<1x1x16x16xf32>
    %18 = vector.shape_cast %17 : vector<1x1x16x16xf32> to vector<1x16x16xf32>
    %c16_i32_22 = arith.constant 16 : i32
    %19 = arith.addi %1, %c16_i32_22 : i32
    %c16_i32_23 = arith.constant 16 : i32
    %20 = arith.cmpi slt, %19, %c16_i32_23 : i32
    %21 = arith.extui %20 : i1 to i32
    %22 = arith.sitofp %21 : i32 to f32
    %23 = vector.broadcast %22 : f32 to vector<1x16x16xf32>
    %24 = arith.mulf %18, %23 : vector<1x16x16xf32>
    %c17_24 = arith.constant 17 : index
    %c1_25 = arith.constant 1 : index
    %c0_26 = arith.constant 0 : index
    %25 = vector.load %arg7[%c17_24, %c1_25, %c0_26] : memref<18x18x16xf32, #tpu.memory_space<vmem>>, vector<1x16x16xf32>
    tpu.vector_store %arg7[%c17_24, %c1_25, %c0_26], %24 {strides = array<i32>} : memref<18x18x16xf32, #tpu.memory_space<vmem>>, vector<1x16x16xf32>,
    %cst_27 = arith.constant 0.000000e+00 : f32
    %26 = vector.broadcast %cst_27 : f32 to vector<256x24xf32>
    %c0_28 = arith.constant 0 : index
    %c0_29 = arith.constant 0 : index
    %c0_30 = arith.constant 0 : index
    %27 = vector.load %arg7[%c0_28, %c0_29, %c0_30] : memref<18x18x16xf32, #tpu.memory_space<vmem>>, vector<18x16x16xf32>
    %28 = vector.extract_strided_slice %27 {offsets = [0, 0, 0], sizes = [16, 16, 16], strides = [1, 1, 1]} : vector<18x16x16xf32> to vector<16x16x16xf32>
    %29 = vector.shape_cast %28 : vector<16x16x16xf32> to vector<256x16xf32>
    %c0_31 = arith.constant 0 : index
    %c0_32 = arith.constant 0 : index
    %c0_33 = arith.constant 0 : index
    %c0_34 = arith.constant 0 : index
    %30 = vector.load %arg5[%c0_31, %c0_32, %c0_33, %c0_34] : memref<3x3x16x24xf32, #tpu.memory_space<vmem>>, vector<1x1x16x24xf32>
    %31 = vector.shape_cast %30 : vector<1x1x16x24xf32> to vector<16x24xf32>
    %cst_35 = arith.constant dense<0.000000e+00> : vector<256x24xf32>
    %32 = tpu.matmul %29, %31, %cst_35 {dimension_numbers = #tpu.dot_dimension_numbers<[1], [0], [0], [1], [0, 0, 1, 1], [], []>} : vector<256x16xf32>, vector<16x24xf32>, vector<256x24xf32> -> vector<256x24xf32>
    %33 = arith.addf %26, %32 : vector<256x24xf32>
    %34 = vector.extract_strided_slice %27 {offsets = [1, 0, 0], sizes = [16, 16, 16], strides = [1, 1, 1]} : vector<18x16x16xf32> to vector<16x16x16xf32>
    %35 = vector.shape_cast %34 : vector<16x16x16xf32> to vector<256x16xf32>
    %c1_36 = arith.constant 1 : index
    %c0_37 = arith.constant 0 : index
    %c0_38 = arith.constant 0 : index
    %c0_39 = arith.constant 0 : index
    %36 = vector.load %arg5[%c1_36, %c0_37, %c0_38, %c0_39] : memref<3x3x16x24xf32, #tpu.memory_space<vmem>>, vector<1x1x16x24xf32>
    %37 = vector.shape_cast %36 : vector<1x1x16x24xf32> to vector<16x24xf32>
    %cst_40 = arith.constant dense<0.000000e+00> : vector<256x24xf32>
    %38 = tpu.matmul %35, %37, %cst_40 {dimension_numbers = #tpu.dot_dimension_numbers<[1], [0], [0], [1], [0, 0, 1, 1], [], []>} : vector<256x16xf32>, vector<16x24xf32>, vector<256x24xf32> -> vector<256x24xf32>
    %39 = arith.addf %33, %38 : vector<256x24xf32>
    %40 = vector.extract_strided_slice %27 {offsets = [2, 0, 0], sizes = [16, 16, 16], strides = [1, 1, 1]} : vector<18x16x16xf32> to vector<16x16x16xf32>
    %41 = vector.shape_cast %40 : vector<16x16x16xf32> to vector<256x16xf32>
    %c2 = arith.constant 2 : index
    %c0_41 = arith.constant 0 : index
    %c0_42 = arith.constant 0 : index
    %c0_43 = arith.constant 0 : index
    %42 = vector.load %arg5[%c2, %c0_41, %c0_42, %c0_43] : memref<3x3x16x24xf32, #tpu.memory_space<vmem>>, vector<1x1x16x24xf32>
    %43 = vector.shape_cast %42 : vector<1x1x16x24xf32> to vector<16x24xf32>
    %cst_44 = arith.constant dense<0.000000e+00> : vector<256x24xf32>
    %44 = tpu.matmul %41, %43, %cst_44 {dimension_numbers = #tpu.dot_dimension_numbers<[1], [0], [0], [1], [0, 0, 1, 1], [], []>} : vector<256x16xf32>, vector<16x24xf32>, vector<256x24xf32> -> vector<256x24xf32>
    %45 = arith.addf %39, %44 : vector<256x24xf32>
    %c0_45 = arith.constant 0 : index
    %c1_46 = arith.constant 1 : index
    %c0_47 = arith.constant 0 : index
    %46 = vector.load %arg7[%c0_45, %c1_46, %c0_47] : memref<18x18x16xf32, #tpu.memory_space<vmem>>, vector<18x16x16xf32>
    %47 = vector.extract_strided_slice %46 {offsets = [0, 0, 0], sizes = [16, 16, 16], strides = [1, 1, 1]} : vector<18x16x16xf32> to vector<16x16x16xf32>
    %48 = vector.shape_cast %47 : vector<16x16x16xf32> to vector<256x16xf32>
    %c0_48 = arith.constant 0 : index
    %c1_49 = arith.constant 1 : index
    %c0_50 = arith.constant 0 : index
    %c0_51 = arith.constant 0 : index
    %49 = vector.load %arg5[%c0_48, %c1_49, %c0_50, %c0_51] : memref<3x3x16x24xf32, #tpu.memory_space<vmem>>, vector<1x1x16x24xf32>
    %50 = vector.shape_cast %49 : vector<1x1x16x24xf32> to vector<16x24xf32>
    %cst_52 = arith.constant dense<0.000000e+00> : vector<256x24xf32>
    %51 = tpu.matmul %48, %50, %cst_52 {dimension_numbers = #tpu.dot_dimension_numbers<[1], [0], [0], [1], [0, 0, 1, 1], [], []>} : vector<256x16xf32>, vector<16x24xf32>, vector<256x24xf32> -> vector<256x24xf32>
    %52 = arith.addf %45, %51 : vector<256x24xf32>
    %53 = vector.extract_strided_slice %46 {offsets = [1, 0, 0], sizes = [16, 16, 16], strides = [1, 1, 1]} : vector<18x16x16xf32> to vector<16x16x16xf32>
    %54 = vector.shape_cast %53 : vector<16x16x16xf32> to vector<256x16xf32>
    %c1_53 = arith.constant 1 : index
    %c1_54 = arith.constant 1 : index
    %c0_55 = arith.constant 0 : index
    %c0_56 = arith.constant 0 : index
    %55 = vector.load %arg5[%c1_53, %c1_54, %c0_55, %c0_56] : memref<3x3x16x24xf32, #tpu.memory_space<vmem>>, vector<1x1x16x24xf32>
    %56 = vector.shape_cast %55 : vector<1x1x16x24xf32> to vector<16x24xf32>
    %cst_57 = arith.constant dense<0.000000e+00> : vector<256x24xf32>
    %57 = tpu.matmul %54, %56, %cst_57 {dimension_numbers = #tpu.dot_dimension_numbers<[1], [0], [0], [1], [0, 0, 1, 1], [], []>} : vector<256x16xf32>, vector<16x24xf32>, vector<256x24xf32> -> vector<256x24xf32>
    %58 = arith.addf %52, %57 : vector<256x24xf32>
    %59 = vector.extract_strided_slice %46 {offsets = [2, 0, 0], sizes = [16, 16, 16], strides = [1, 1, 1]} : vector<18x16x16xf32> to vector<16x16x16xf32>
    %60 = vector.shape_cast %59 : vector<16x16x16xf32> to vector<256x16xf32>
    %c2_58 = arith.constant 2 : index
    %c1_59 = arith.constant 1 : index
    %c0_60 = arith.constant 0 : index
    %c0_61 = arith.constant 0 : index
    %61 = vector.load %arg5[%c2_58, %c1_59, %c0_60, %c0_61] : memref<3x3x16x24xf32, #tpu.memory_space<vmem>>, vector<1x1x16x24xf32>
    %62 = vector.shape_cast %61 : vector<1x1x16x24xf32> to vector<16x24xf32>
    %cst_62 = arith.constant dense<0.000000e+00> : vector<256x24xf32>
    %63 = tpu.matmul %60, %62, %cst_62 {dimension_numbers = #tpu.dot_dimension_numbers<[1], [0], [0], [1], [0, 0, 1, 1], [], []>} : vector<256x16xf32>, vector<16x24xf32>, vector<256x24xf32> -> vector<256x24xf32>
    %64 = arith.addf %58, %63 : vector<256x24xf32>
    %c0_63 = arith.constant 0 : index
    %c2_64 = arith.constant 2 : index
    %c0_65 = arith.constant 0 : index
    %65 = vector.load %arg7[%c0_63, %c2_64, %c0_65] : memref<18x18x16xf32, #tpu.memory_space<vmem>>, vector<18x16x16xf32>
    %66 = vector.extract_strided_slice %65 {offsets = [0, 0, 0], sizes = [16, 16, 16], strides = [1, 1, 1]} : vector<18x16x16xf32> to vector<16x16x16xf32>
    %67 = vector.shape_cast %66 : vector<16x16x16xf32> to vector<256x16xf32>
    %c0_66 = arith.constant 0 : index
    %c2_67 = arith.constant 2 : index
    %c0_68 = arith.constant 0 : index
    %c0_69 = arith.constant 0 : index
    %68 = vector.load %arg5[%c0_66, %c2_67, %c0_68, %c0_69] : memref<3x3x16x24xf32, #tpu.memory_space<vmem>>, vector<1x1x16x24xf32>
    %69 = vector.shape_cast %68 : vector<1x1x16x24xf32> to vector<16x24xf32>
    %cst_70 = arith.constant dense<0.000000e+00> : vector<256x24xf32>
    %70 = tpu.matmul %67, %69, %cst_70 {dimension_numbers = #tpu.dot_dimension_numbers<[1], [0], [0], [1], [0, 0, 1, 1], [], []>} : vector<256x16xf32>, vector<16x24xf32>, vector<256x24xf32> -> vector<256x24xf32>
    %71 = arith.addf %64, %70 : vector<256x24xf32>
    %72 = vector.extract_strided_slice %65 {offsets = [1, 0, 0], sizes = [16, 16, 16], strides = [1, 1, 1]} : vector<18x16x16xf32> to vector<16x16x16xf32>
    %73 = vector.shape_cast %72 : vector<16x16x16xf32> to vector<256x16xf32>
    %c1_71 = arith.constant 1 : index
    %c2_72 = arith.constant 2 : index
    %c0_73 = arith.constant 0 : index
    %c0_74 = arith.constant 0 : index
    %74 = vector.load %arg5[%c1_71, %c2_72, %c0_73, %c0_74] : memref<3x3x16x24xf32, #tpu.memory_space<vmem>>, vector<1x1x16x24xf32>
    %75 = vector.shape_cast %74 : vector<1x1x16x24xf32> to vector<16x24xf32>
    %cst_75 = arith.constant dense<0.000000e+00> : vector<256x24xf32>
    %76 = tpu.matmul %73, %75, %cst_75 {dimension_numbers = #tpu.dot_dimension_numbers<[1], [0], [0], [1], [0, 0, 1, 1], [], []>} : vector<256x16xf32>, vector<16x24xf32>, vector<256x24xf32> -> vector<256x24xf32>
    %77 = arith.addf %71, %76 : vector<256x24xf32>
    %78 = vector.extract_strided_slice %65 {offsets = [2, 0, 0], sizes = [16, 16, 16], strides = [1, 1, 1]} : vector<18x16x16xf32> to vector<16x16x16xf32>
    %79 = vector.shape_cast %78 : vector<16x16x16xf32> to vector<256x16xf32>
    %c2_76 = arith.constant 2 : index
    %c2_77 = arith.constant 2 : index
    %c0_78 = arith.constant 0 : index
    %c0_79 = arith.constant 0 : index
    %80 = vector.load %arg5[%c2_76, %c2_77, %c0_78, %c0_79] : memref<3x3x16x24xf32, #tpu.memory_space<vmem>>, vector<1x1x16x24xf32>
    %81 = vector.shape_cast %80 : vector<1x1x16x24xf32> to vector<16x24xf32>
    %cst_80 = arith.constant dense<0.000000e+00> : vector<256x24xf32>
    %82 = tpu.matmul %79, %81, %cst_80 {dimension_numbers = #tpu.dot_dimension_numbers<[1], [0], [0], [1], [0, 0, 1, 1], [], []>} : vector<256x16xf32>, vector<16x24xf32>, vector<256x24xf32> -> vector<256x24xf32>
    %83 = arith.addf %77, %82 : vector<256x24xf32>
    %84 = vector.shape_cast %83 : vector<256x24xf32> to vector<16x16x24xf32>
    %c0_81 = arith.constant 0 : index
    %c0_82 = arith.constant 0 : index
    %c0_83 = arith.constant 0 : index
    %c0_84 = arith.constant 0 : index
    %85 = vector.load %arg6[%c0_81, %c0_82, %c0_83, %c0_84] : memref<1x16x16x24xf32, #tpu.memory_space<vmem>>, vector<1x16x16x24xf32>
    %86 = vector.shape_cast %85 : vector<1x16x16x24xf32> to vector<16x16x24xf32>
    %87 = vector.shape_cast %84 : vector<16x16x24xf32> to vector<1x16x16x24xf32>
    tpu.vector_store %arg6[%c0_81, %c0_82, %c0_83, %c0_84], %87 {strides = array<i32>} : memref<1x16x16x24xf32, #tpu.memory_space<vmem>>, vector<1x16x16x24xf32>,
    return
  }
  func.func @transform_0(%arg0: i32, %arg1: i32) -> (i32, i32, i32, i32) {
    %c0_i32 = arith.constant 0 : i32
    %c0_i32_0 = arith.constant 0 : i32
    %c0_i32_1 = arith.constant 0 : i32
    return %arg0, %arg1, %c0_i32, %c0_i32_0 : i32, i32, i32, i32
  }
  func.func @transform_1(%arg0: i32, %arg1: i32) -> (i32, i32, i32, i32) {
    %c16_i32 = arith.constant 16 : i32
    %0 = arith.muli %arg1, %c16_i32 : i32
    %c1_i32 = arith.constant 1 : i32
    %1 = arith.subi %0, %c1_i32 : i32
    %c0_i32 = arith.constant 0 : i32
    %2 = arith.maxsi %1, %c0_i32 : i32
    %c0_i32_0 = arith.constant 0 : i32
    %c0_i32_1 = arith.constant 0 : i32
    %c0_i32_2 = arith.constant 0 : i32
    return %arg0, %2, %c0_i32_0, %c0_i32_1 : i32, i32, i32, i32
  }
  func.func @transform_2(%arg0: i32, %arg1: i32) -> (i32, i32, i32, i32) {
    %c1_i32 = arith.constant 1 : i32
    %0 = arith.addi %arg1, %c1_i32 : i32
    %c16_i32 = arith.constant 16 : i32
    %1 = arith.muli %0, %c16_i32 : i32
    %c15_i32 = arith.constant 15 : i32
    %2 = arith.minsi %1, %c15_i32 : i32
    %c0_i32 = arith.constant 0 : i32
    %c0_i32_0 = arith.constant 0 : i32
    %c0_i32_1 = arith.constant 0 : i32
    return %arg0, %2, %c0_i32, %c0_i32_0 : i32, i32, i32, i32
  }
  func.func @transform_3(%arg0: i32, %arg1: i32) -> (i32, i32, i32, i32) {
    %c0_i32 = arith.constant 0 : i32
    %c0_i32_0 = arith.constant 0 : i32
    %c0_i32_1 = arith.constant 0 : i32
    %c0_i32_2 = arith.constant 0 : i32
    %c0_i32_3 = arith.constant 0 : i32
    return %c0_i32, %c0_i32_0, %c0_i32_1, %c0_i32_2 : i32, i32, i32, i32
  }
  func.func @transform_4(%arg0: i32, %arg1: i32) -> (i32, i32, i32, i32) {
    %c0_i32 = arith.constant 0 : i32
    %c0_i32_0 = arith.constant 0 : i32
    %c0_i32_1 = arith.constant 0 : i32
    return %arg0, %arg1, %c0_i32, %c0_i32_0 : i32, i32, i32, i32
  }
}

</mosaic_0001>

<bundles_post_ra>
// kernel: tile.9
= control target key start
LH: loop header
LB: loop body
LE: loop exit
PB: predicated region body
PF: predicated region fallthrough
CT: control target
= control target key end

     0   :  { %vm7_vm0 = vcmask 130048   ;;  %vm13_vm1 = vcmask 261248   ;;  %s39_s0 = inlined_call_operand.vmem [shape: f32[2,16], index: 0, kind: input, shape index: {}]   ;;  %s40_s1 = inlined_call_operand.vmem [shape: f32[1,32], index: 1, kind: output, shape index: {}]  }
   0x1   :  { %v4_v0 = vld [vmem:[%s39_s0] sm:$0x3]  ;;  %s22_s0 = smov 16  }
   0x2   :  { %5 = vst [vmem:[#allocation1] sm:$0x3] %v4_v0 }
   0x9   :  { %v10_v1 = vld [vmem:[#allocation1 + $0x1] sm:$0x1]   ;;  %v6_v2 = vld [vmem:[#allocation1] sm:$0x1]  }
   0xa   :  { %11 = vrot.lane.b32.xlu0 %v10_v1, %s22_s0  ;;  %8 = vst.msk [vmem:[#allocation0] sm:$0x1] %vm7_vm0, %v6_v2  }
  0x7c   :  { %v12_v3 = vpop.permute.xlu0 %11  }
  0x7d   :  { %14 = vst.msk [vmem:[#allocation0] sm:$0x1] %vm13_vm1, %v12_v3  }
  0x84   :  { %v17_v4 = vld [vmem:[#allocation0] sm:$0x1] }
  0x85   :  { %20 = vst [vmem:[%s40_s1] sm:$0x1] %v17_v4 }

// kernel: tile.8
= control target key start
LH: loop header
LB: loop body
LE: loop exit
PB: predicated region body
PF: predicated region fallthrough
CT: control target
= control target key end

     0   :  { %s22_s0 = inlined_call_operand.vmem [shape: f32[16], index: 0, kind: input, shape index: {}]   ;;  %s23_s1 = inlined_call_operand.vmem [shape: f32[2,16], index: 1, kind: output, shape index: {}]  }
   0x1   :  { %v4_v0 = vld [vmem:[%s22_s0] ss:$0 sm:$0xff] }
   0x2   :  { %5 = vst [vmem:[%s23_s1] sm:$0x3] %v4_v0 }

// kernel: reassemble_forward.2
= control target key start
LH: loop header
LB: loop body
LE: loop exit
PB: predicated region body
PF: predicated region fallthrough
CT: control target
= control target key end

     0   :  { %s714_s18 = smov 0   ;;  %s716_s19 = smov 0   ;;  %s842_s0 = inlined_call_operand.vmem [shape: f32[2,8,8,32], index: 0, kind: input, shape index: {}]   ;;  %s843_s1 = inlined_call_operand.vmem [shape: f32[32,16], index: 1, kind: input, shape index: {}]   ;;  %s844_s2 = inlined_call_operand.vmem [shape: f32[1,16], index: 2, kind: input, shape index: {}]   ;;  %s845_s3 = inlined_call_operand.vmem [shape: f32[2,16,32], index: 3, kind: input, shape index: {}]   ;;  %s846_s4 = inlined_call_operand.vmem [shape: f32[1,32], index: 4, kind: input, shape index: {}]   ;;  %s847_s5 = inlined_call_operand.vmem [shape: f32[2,8,2,8,32], index: 5, kind: output, shape index: {}]  }
   0x1   :  { %s718_s20 = smov 0  }
   0x2 LB: > { %s27_s21 = sadd.s32 1, %s678_s19  ;;  %p582_p0 = scmp.ge.s32.totalorder %s682_s20, 1  ;;  %s682_s20 = sphi %s718_s20, %s15_s20   ;;  %s678_s19 = sphi %s716_s19, %s849_s19   ;;  %s674_s18 = sphi %s714_s18, %s848_s18  }
   0x3   : > { %p29_p1 = scmp.ge.s32.totalorder %s27_s21, 2  ;;  %p208_p2 = scmp.lt.s32.totalorder %s682_s20, 3 }
   0x5   : > { %s851_s21 = smov (%p29_p1, %s27_s21), 0  ;;  %p209_p3 = pnand %p582_p0, %p208_p2 }
   0x6   : > { %p246_p4 = scmp.lt.s32.totalorder (!%p209_p3), %s674_s18, 1 }
   0x7   : > { %212 = sbr.rel (%p209_p3) target bundleno = 331 (0x14b), region = 40 }
   0xc   : > { %v277_v0 = vld [vmem:[%s843_s1 + $0x18] sm:$0xff]  ;;  %v276_v1 = vld [vmem:[%s843_s1 + $0x10] sm:$0xff]  ;;  %v275_v2 = vld [vmem:[%s843_s1 + $0x8] sm:$0xff]  ;;  %s853_s18 = smov (!%p246_p4, %s674_s18), 1  ;;  %vm282_vm0 = vcmask 261120   ;;  %vm354_vm1 = vcmask 130048  }
   0xd   : > { %319 = vmatpush.msra.mxu0 %v277_v0  ;;  %625 = vmatpush.msra.mxu3 %v277_v0  ;;  %v274_v3 = vld [vmem:[%s843_s1] sm:$0xff]  ;;  %s623_s30 = sshll.u32 %s853_s18, 6  ;;  %v349_v12 = vld [vmem:[%s845_s3 + $0x8] sm:$0xff]  ;;  %v604_v13 = vld [vmem:[%s845_s3 + $0x18] sm:$0xff]  ;;  %s624_s23 = sshll.u32 %s853_s18, 7 }
   0xe   : > { %s253_s8 = scalar_lea.vmem %s842_s0, %s623_s30  ;;  %393 = vmatpush.msra.mxu1 %v349_v12  ;;  %449 = vmatpush.msra.mxu2 %v604_v13  ;;  %v348_v14 = vld [vmem:[%s845_s3] sm:$0xff]  ;;  %v603_v15 = vld [vmem:[%s845_s3 + $0x10] sm:$0xff]  ;;  %s796_s28 = scalar_lea.vmem %s847_s5, %s624_s23 }
   0xf   : > { %320 = vmatpush.msra.mxu0 %v276_v1  ;;  %626 = vmatpush.msra.mxu3 %v276_v1  ;;  %v266_v4 = vld [vmem:[%s253_s8] sm:$0xff]  ;;  %v272_v5 = vld [vmem:[%s253_s8 + $0x30] sm:$0xff]  ;;  %v267_v6 = vld [vmem:[%s253_s8 + $0x8] sm:$0xff] }
  0x10   : > { %v273_v7 = vld [vmem:[%s253_s8 + $0x38] sm:$0xff]  ;;  %v268_v8 = vld [vmem:[%s253_s8 + $0x10] sm:$0xff]  ;;  %v270_v10 = vld [vmem:[%s253_s8 + $0x20] sm:$0xff]  ;;  %394 = vmatpush.msra.mxu1 %v348_v14  ;;  %450 = vmatpush.msra.mxu2 %v603_v15 }
  0x11   : > { %321 = vmatpush.msra.mxu0 %v275_v2  ;;  %627 = vmatpush.msra.mxu3 %v275_v2  ;;  %v269_v9 = vld [vmem:[%s253_s8 + $0x18] sm:$0xff]  ;;  %v271_v11 = vld [vmem:[%s253_s8 + $0x28] sm:$0xff]  ;;  %v657_v16 = vld [vmem:[%s844_s2] ss:$0 sm:$0xff] }
  0x12   : > { %v658_v33 = vld [vmem:[%s846_s4] ss:$0 sm:$0xff] }
  0x13   : > { %322 = vmatpush.msra.mxu0 %v274_v3  ;;  %628 = vmatpush.msra.mxu3 %v274_v3  ;;  %v659_v36 = vld [vmem:[%s846_s4] ss:$0 sm:$0xff] }
  0x14   : > { %587 = vmatmul.msk.f32.vlgmr.msra.gmra.mxu0 %vm282_vm0, %v266_v4  ;;  %593 = vmatmul.msk.f32.vlgmr.msra.gmra.mxu3 %vm282_vm0, %v272_v5 }
  0x15   : > { %629 = vmatpush.msrb.mxu3 %v349_v12 }
  0x17   : > { %630 = vmatpush.msrb.mxu3 %v348_v14 }
  0x19   : > { %631 = vmatpush.msra.mxu3 %v604_v13 }
  0x1b   : > { %632 = vmatpush.msra.mxu3 %v603_v15 }
  0x1c   : > { %588 = vmatmul.msk.f32.gmra.mxu0 %vm282_vm0, %v267_v6  ;;  %594 = vmatmul.msk.f32.gmra.mxu3 %vm282_vm0, %v273_v7 }
  0x24   : > { %589 = vmatmul.msk.f32.gmra.mxu0 %vm282_vm0, %v268_v8 }
  0x2c   : > { %590 = vmatmul.msk.f32.gmra.mxu0 %vm282_vm0, %v269_v9 }
  0x34   : > { %591 = vmatmul.msk.f32.gmra.mxu0 %vm282_vm0, %v270_v10 }
  0x3c   : > { %592 = vmatmul.msk.f32.gmra.mxu0 %vm282_vm0, %v271_v11 }
  0x91   : > { %v324_v17 = vpop.f32.mrf.mxu0 }
  0x92   : > { %v325_v18 = vadd.f32 %v657_v16, %v324_v17 }
  0x94   : > { %595 = vmatmul.msk.f32.vlgmr.msra.gmra.mxu1 %vm354_vm1, %v325_v18  ;;  %605 = vmatmul.msk.f32.vlgmr.msra.gmra.mxu2 %vm354_vm1, %v325_v18 }
  0x97   : > { %v342_v19 = vpop.f32.mrf.mxu3 }
  0x98   : > { %v343_v32 = vadd.f32 %v657_v16, %v342_v19 }
  0x99   : > { %v327_v20 = vpop.f32.mrf.mxu0 }
  0x9a   : > { %v328_v21 = vadd.f32 %v657_v16, %v327_v20 }
  0x9c   : > { %596 = vmatmul.msk.f32.gmra.mxu1 %vm354_vm1, %v328_v21  ;;  %606 = vmatmul.msk.f32.gmra.mxu2 %vm354_vm1, %v328_v21 }
  0x9f   : > { %v345_v22 = vpop.f32.mrf.mxu3 }
  0xa0   : > { %v346_v23 = vadd.f32 %v657_v16, %v345_v22 }
  0xa1   : > { %v330_v24 = vpop.f32.mrf.mxu0 }
  0xa2   : > { %v331_v25 = vadd.f32 %v657_v16, %v330_v24  ;;  %602 = vmatmul.msk.f32.vlgmr.msrb.gmra.mxu3 %vm354_vm1, %v346_v23 }
  0xa4   : > { %597 = vmatmul.msk.f32.gmra.mxu1 %vm354_vm1, %v331_v25  ;;  %607 = vmatmul.msk.f32.gmra.mxu2 %vm354_vm1, %v331_v25 }
  0xa9   : > { %v333_v26 = vpop.f32.mrf.mxu0 }
  0xaa   : > { %v334_v27 = vadd.f32 %v657_v16, %v333_v26  ;;  %612 = vmatmul.msk.f32.vlgmr.msra.gmra.mxu3 %vm354_vm1, %v346_v23 }
  0xac   : > { %598 = vmatmul.msk.f32.gmra.mxu1 %vm354_vm1, %v334_v27  ;;  %608 = vmatmul.msk.f32.gmra.mxu2 %vm354_vm1, %v334_v27 }
  0xb1   : > { %v336_v28 = vpop.f32.mrf.mxu0 }
  0xb2   : > { %v337_v29 = vadd.f32 %v657_v16, %v336_v28 }
  0xb4   : > { %599 = vmatmul.msk.f32.gmra.mxu1 %vm354_vm1, %v337_v29  ;;  %609 = vmatmul.msk.f32.gmra.mxu2 %vm354_vm1, %v337_v29 }
  0xb9   : > { %v339_v30 = vpop.f32.mrf.mxu0 }
  0xba   : > { %v340_v31 = vadd.f32 %v657_v16, %v339_v30 }
  0xbc   : > { %600 = vmatmul.msk.f32.gmra.mxu1 %vm354_vm1, %v340_v31  ;;  %610 = vmatmul.msk.f32.gmra.mxu2 %vm354_vm1, %v340_v31 }
  0xc4   : > { %601 = vmatmul.msk.f32.gmra.mxu1 %vm354_vm1, %v343_v32  ;;  %611 = vmatmul.msk.f32.gmra.mxu2 %vm354_vm1, %v343_v32 }
 0x111   : > { %v396_v34 = vpop.f32.mrf.mxu1 }
 0x112   : > { %v397_v35 = vadd.f32 %v658_v33, %v396_v34 }
 0x114   : > { %420 = vst.msk [vmem:[%s796_s28] sm:$0xff] %vm282_vm0, %v397_v35 }
 0x117   : > { %v452_v37 = vpop.f32.mrf.mxu2 }
 0x118   : > { %v453_v38 = vadd.f32 %v659_v36, %v452_v37 }
 0x119   : > { %v399_v39 = vpop.f32.mrf.mxu1 }
 0x11a   : > { %613 = vst.msk [vmem:[%s796_s28 + $0x8] sm:$0xff] %vm282_vm0, %v453_v38  ;;  %v400_v40 = vadd.f32 %v658_v33, %v399_v39 }
 0x11c   : > { %421 = vst.msk [vmem:[%s796_s28 + $0x10] sm:$0xff] %vm282_vm0, %v400_v40 }
 0x11f   : > { %v455_v41 = vpop.f32.mrf.mxu2 }
 0x120   : > { %v456_v42 = vadd.f32 %v659_v36, %v455_v41 }
 0x121   : > { %v402_v43 = vpop.f32.mrf.mxu1 }
 0x122   : > { %614 = vst.msk [vmem:[%s796_s28 + $0x18] sm:$0xff] %vm282_vm0, %v456_v42  ;;  %v403_v44 = vadd.f32 %v658_v33, %v402_v43 }
 0x124   : > { %422 = vst.msk [vmem:[%s796_s28 + $0x20] sm:$0xff] %vm282_vm0, %v403_v44 }
 0x125   : > { %v417_v45 = vpop.f32.mrf.mxu3 }
 0x126   : > { %v418_v46 = vadd.f32 %v658_v33, %v417_v45 }
 0x127   : > { %v458_v47 = vpop.f32.mrf.mxu2 }
 0x128   : > { %v459_v48 = vadd.f32 %v659_v36, %v458_v47  ;;  %427 = vst.msk [vmem:[%s796_s28 + $0x70] sm:$0xff] %vm282_vm0, %v418_v46 }
 0x129   : > { %v405_v49 = vpop.f32.mrf.mxu1 }
 0x12a   : > { %615 = vst.msk [vmem:[%s796_s28 + $0x28] sm:$0xff] %vm282_vm0, %v459_v48  ;;  %v406_v50 = vadd.f32 %v658_v33, %v405_v49 }
 0x12c   : > { %423 = vst.msk [vmem:[%s796_s28 + $0x30] sm:$0xff] %vm282_vm0, %v406_v50 }
 0x12d   : > { %v473_v51 = vpop.f32.mrf.mxu3 }
 0x12e   : > { %v474_v52 = vadd.f32 %v659_v36, %v473_v51 }
 0x12f   : > { %v461_v53 = vpop.f32.mrf.mxu2 }
 0x130   : > { %v462_v54 = vadd.f32 %v659_v36, %v461_v53  ;;  %620 = vst.msk [vmem:[%s796_s28 + $0x78] sm:$0xff] %vm282_vm0, %v474_v52 }
 0x131   : > { %v408_v55 = vpop.f32.mrf.mxu1 }
 0x132   : > { %616 = vst.msk [vmem:[%s796_s28 + $0x38] sm:$0xff] %vm282_vm0, %v462_v54  ;;  %v409_v56 = vadd.f32 %v658_v33, %v408_v55 }
 0x134   : > { %424 = vst.msk [vmem:[%s796_s28 + $0x40] sm:$0xff] %vm282_vm0, %v409_v56 }
 0x137   : > { %v464_v57 = vpop.f32.mrf.mxu2 }
 0x138   : > { %v465_v58 = vadd.f32 %v659_v36, %v464_v57 }
 0x139   : > { %v411_v59 = vpop.f32.mrf.mxu1 }
 0x13a   : > { %617 = vst.msk [vmem:[%s796_s28 + $0x48] sm:$0xff] %vm282_vm0, %v465_v58  ;;  %v412_v60 = vadd.f32 %v658_v33, %v411_v59 }
 0x13c   : > { %425 = vst.msk [vmem:[%s796_s28 + $0x50] sm:$0xff] %vm282_vm0, %v412_v60 }
 0x13f   : > { %v467_v61 = vpop.f32.mrf.mxu2 }
 0x140   : > { %v468_v62 = vadd.f32 %v659_v36, %v467_v61 }
 0x141   : > { %v414_v63 = vpop.f32.mrf.mxu1 }
 0x142   : > { %618 = vst.msk [vmem:[%s796_s28 + $0x58] sm:$0xff] %vm282_vm0, %v468_v62  ;;  %v415_v0 = vadd.f32 %v658_v33, %v414_v63 }
 0x144   : > { %426 = vst.msk [vmem:[%s796_s28 + $0x60] sm:$0xff] %vm282_vm0, %v415_v0 }
 0x147   : > { %v470_v1 = vpop.f32.mrf.mxu2 }
 0x148   : > { %v471_v2 = vadd.f32 %v659_v36, %v470_v1 }
 0x14a   : > { %619 = vst.msk [vmem:[%s796_s28 + $0x68] sm:$0xff] %vm282_vm0, %v471_v2 }
 0x14b PF: > { %s15_s20 = sadd.s32 1, %s682_s20   ;;  %s848_s18 = smov %s678_s19 }
 0x14c   : > { %p12_p5 = scmp.ge.s32.totalorder %s15_s20, 4   ;;  %s849_s19 = smov %s851_s21 }
 0x14e   :  { %14 = sbr.rel (!%p12_p5) target bundleno = 2 (0x2), region = 72 }

// kernel: reassemble_forward.3
= control target key start
LH: loop header
LB: loop body
LE: loop exit
PB: predicated region body
PF: predicated region fallthrough
CT: control target
= control target key end

     0   :  { %9 = vsyncpa [#allocation4], 0  ;;  %s3962_s0 = inlined_call_operand.vmem [shape: f32[2,16,16,16], index: 0, kind: input, shape index: {}, may-alias: {0,1,2}]   ;;  %s3963_s1 = inlined_call_operand.vmem [shape: f32[2,16,16,16], index: 1, kind: input, shape index: {}, may-alias: {0,1,2}]   ;;  %s3964_s2 = inlined_call_operand.vmem [shape: f32[2,16,16,16], index: 2, kind: input, shape index: {}, may-alias: {0,1,2}]   ;;  %s3965_s3 = inlined_call_operand.vmem [shape: f32[3,3,16,24], index: 3, kind: input, shape index: {}]   ;;  %s3966_s4 = inlined_call_operand.hbm [shape: f32[2,16,16,24], index: 4, kind: output, shape index: {}]  }
   0x1   :  { %11 = vsyncpa [#allocation4 + $0x1], 0  ;;  %s2854_s15 = smov 0   ;;  %s2856_s16 = smov 0  }
   0x2   :  { %s2858_s17 = smov 0   ;;  %s2860_s18 = smov 0  }
   0x3   :  { %s2862_s19 = smov 0   ;;  %s2864_s20 = smov 0  }
   0x4 LB: > { %s2355_s21 = sadd.s32 4294967295, %s2824_s20   ;;  %s2356_s22 = sadd.s32 4294967294, %s2824_s20   ;;  %s2824_s20 = sphi %s2864_s20, %s17_s20   ;;  %s2820_s19 = sphi %s2862_s19, %s4000_s19   ;;  %s2816_s18 = sphi %s2860_s18, %s3999_s18   ;;  %s2812_s17 = sphi %s2858_s17, %s3998_s17   ;;  %s2808_s16 = sphi %s2856_s16, %s3997_s16   ;;  %s2804_s15 = sphi %s2854_s15, %s3996_s15  }
   0x5   : > { %s29_s23 = sadd.s32 1, %s2820_s19  ;;  %s159_s24 = sadd.s32 1, %s2812_s17 }
   0x6   : > { %p31_p0 = scmp.ge.s32.totalorder %s29_s23, 2  ;;  %p169_p1 = scmp.ne.s32.totalorder %s2812_s17, %s2808_s16 }
   0x7   : > { %p170_p2 = scmp.eq.s32.totalorder %s2355_s21, 1  ;;  %p175_p3 = scmp.ne.s32.totalorder %s2808_s16, %s2804_s15 }
   0x8   : > { %s4002_s23 = smov (%p31_p0, %s29_s23), 0  ;;  %p176_p5 = scmp.eq.s32.totalorder %s2356_s22, 1 }
   0x9   : > { %p2894_p4 = por %p170_p2, %p169_p1  ;;  %s154_s26 = ssub.s32 %s2820_s19, %s4002_s23 }
   0xa   : > { %p2359_p6 = scmp.ge.s32.totalorder %s2824_s20, 1  ;;  %p157_p7 = scmp.eq.s32.totalorder %s154_s26, 0 }
   0xb   : > { %p2901_p8 = por %p176_p5, %p175_p3  ;;  %p251_p9 = scmp.lt.s32.totalorder %s2824_s20, 3 }
   0xc   : > { %s2907_s28 = scalar_select %p157_p7, %s2812_s17, %s159_s24  }
   0xd   : > { %p252_p10 = pnand %p2359_p6, %p251_p9 }
   0xf   : > { %255 = sbr.rel (%p252_p10) target bundleno = 776 (0x308), region = 36 }
  0x14   : > { %v2368_v0 = vld [vmem:[%s3965_s3 + $0x38] sm:$0xff]  ;;  %v2367_v1 = vld [vmem:[%s3965_s3 + $0x30] sm:$0xff]  ;;  %p309_p11 = scmp.lt.s32.totalorder %s2816_s18, 1  ;;  %vm355_vm0 = vcmask 122880   ;;  %v2826_v2 = vmov 0.0   ;;  %vm400_vm1 = vcmask 130048  }
  0x15   : > { %2682 = vmatpush.msra.mxu1 %v2368_v0  ;;  %2683 = vmatpush.msra.mxu2 %v2368_v0  ;;  %361 = vst.msk [vmem:[#allocation2 + $0x78] sm:$0x1] %vm355_vm0, %v2826_v2  ;;  %v2434_v5 = vld [vmem:[%s3965_s3 + $0x68] sm:$0xff]  ;;  %v2468_v6 = vld [vmem:[%s3965_s3 + $0x18] sm:$0xff]  ;;  %v2433_v24 = vld [vmem:[%s3965_s3 + $0x60] sm:$0xff]  ;;  %s305_s30 = sand.u32 1, %s2808_s16  }
  0x16   : > { %2684 = vmatpush.msra.mxu3 %v2368_v0  ;;  %s310_s7 = scalar_select %p309_p11, %s2816_s18, 1  ;;  %356 = vst.msk [vmem:[#allocation2] sm:$0x1] %vm355_vm0, %v2826_v2  ;;  %631 = vmatpush.msra.mxu0 %v2368_v0  ;;  %v517_v7 = vld [vmem:[%s3965_s3 + $0x8] sm:$0xff]  ;;  %v2467_v26 = vld [vmem:[%s3965_s3 + $0x10] sm:$0xff]  ;;  %v516_v27 = vld [vmem:[%s3965_s3] sm:$0xff] }
  0x17   : > { %2685 = vmatpush.msra.mxu1 %v2367_v1  ;;  %2686 = vmatpush.msra.mxu2 %v2367_v1  ;;  %357 = vst.msk [vmem:[#allocation2 + $0x18] sm:$0x1] %vm355_vm0, %v2826_v2  ;;  %v2502_v8 = vld [vmem:[%s3965_s3 + $0x48] sm:$0xff]  ;;  %v2501_v41 = vld [vmem:[%s3965_s3 + $0x40] sm:$0xff]  ;;  %s2360_s5 = sshll.u32 %s305_s30, 8  ;;  %vm2179_vm2 = vcmask 195584  }
  0x18   : > { %s2920_s8 = sshll.u32 %s310_s7, 8  ;;  %358 = vst.msk [vmem:[#allocation2 + $0x30] sm:$0x1] %vm355_vm0, %v2826_v2  ;;  %2687 = vmatpush.msra.mxu3 %v2367_v1  ;;  %632 = vmatpush.msra.mxu0 %v2367_v1  ;;  %s3758_s6 = scalar_lea.vmem [#allocation3], %s2360_s5 }
  0x19   : > { %s2927_s11 = scalar_lea.vmem %s3962_s0, %s2920_s8  ;;  %359 = vst.msk [vmem:[#allocation2 + $0x48] sm:$0x1] %vm355_vm0, %v2826_v2  ;;  %872 = vmatpush.msrb.mxu2 %v2434_v5  ;;  %750 = vmatpush.msrb.mxu1 %v517_v7  ;;  %s331_s22 = scalar_lea.vmem %s3963_s1, %s2920_s8  ;;  %v2536_v7 = vld [vmem:[%s3965_s3 + $0x78] sm:$0xff] }
  0x1a   : > { %v411_v3 = vld [vmem:[%s2927_s11 + $0x40] sm:$0xff]  ;;  %360 = vst.msk [vmem:[#allocation2 + $0x60] sm:$0x1] %vm355_vm0, %v2826_v2  ;;  %1152 = vmatpush.msrb.mxu3 %v2468_v6  ;;  %1306 = vmatpush.msrb.mxu0 %v2502_v8  ;;  %v412_v11 = vld [vmem:[%s2927_s11 + $0x48] sm:$0xff]  ;;  %v413_v15 = vld [vmem:[%s2927_s11 + $0x50] sm:$0xff]  ;;  %s2679_s24 = sadd.s32 240, %s2920_s8 }
  0x1b   : > { %444 = vst.msk [vmem:[#allocation2 + $0x79] sm:$0xff] %vm400_vm1, %v411_v3  ;;  %v419_v9 = vld [vmem:[%s2927_s11 + $0x80] sm:$0xff]  ;;  %v420_v12 = vld [vmem:[%s2927_s11 + $0x88] sm:$0xff]  ;;  %v421_v16 = vld [vmem:[%s2927_s11 + $0x90] sm:$0xff]  ;;  %873 = vmatpush.msrb.mxu2 %v2433_v24  ;;  %751 = vmatpush.msrb.mxu1 %v516_v27  ;;  %s348_s8 = scalar_lea.vmem %s3964_s2, %s2679_s24  ;;  %s2680_s7 = sshll.u32 %s2816_s18, 8 }
  0x1c   : > { %362 = vst.msk [vmem:[#allocation2 + $0x90] sm:$0x1] %vm355_vm0, %v2826_v2  ;;  %v427_v10 = vld [vmem:[%s2927_s11 + $0xc0] sm:$0xff]  ;;  %v428_v14 = vld [vmem:[%s2927_s11 + $0xc8] sm:$0xff]  ;;  %v429_v18 = vld [vmem:[%s2927_s11 + $0xd0] sm:$0xff]  ;;  %1153 = vmatpush.msrb.mxu3 %v2467_v26  ;;  %1307 = vmatpush.msrb.mxu0 %v2501_v41  ;;  %s2227_s12 = scalar_lea.hbm %s3966_s4, %s2680_s7  ;;  %s2228_s13 = sshll.u32 %s3758_s6, 4  ;;  %s2229_s13 = int_to_ptr.vmem [resolvable:$true] %s2228_s13 }
  0x1d   : > { %363 = vst.msk [vmem:[#allocation2 + $0xa8] sm:$0x1] %vm355_vm0, %v2826_v2  ;;  %v403_v13 = vld [vmem:[%s2927_s11] sm:$0xff]  ;;  %v404_v17 = vld [vmem:[%s2927_s11 + $0x8] sm:$0xff]  ;;  %v414_v20 = vld [vmem:[%s2927_s11 + $0x58] sm:$0xff]  ;;  %s2230_s14 = sshll.u32 %s2227_s12, 4  ;;  %s2231_s14 = int_to_ptr.hbm [resolvable:$true] %s2230_s14 }
  0x1e   : > { %364 = vst.msk [vmem:[#allocation2 + $0xc0] sm:$0x1] %vm355_vm0, %v2826_v2  ;;  %v422_v21 = vld [vmem:[%s2927_s11 + $0x98] sm:$0xff]  ;;  %v405_v23 = vld [vmem:[%s2927_s11 + $0x10] sm:$0xff]  ;;  %v415_v30 = vld [vmem:[%s2927_s11 + $0x60] sm:$0xff]  ;;  %s2213_s18 = scalar_lea.sflag [#allocation4], %s305_s30 }
  0x1f   : > { %365 = vst.msk [vmem:[#allocation2 + $0xd8] sm:$0x1] %vm355_vm0, %v2826_v2  ;;  %v430_v28 = vld [vmem:[%s2927_s11 + $0xd8] sm:$0xff]  ;;  %v423_v31 = vld [vmem:[%s2927_s11 + $0xa0] sm:$0xff]  ;;  %v416_v37 = vld [vmem:[%s2927_s11 + $0x68] sm:$0xff]  ;;  %s2760_s21 = sshra.s32 %s2231_s14, 4  ;;  %s2761_s21 = int_to_ptr.hbm [resolvable:$true] %s2760_s21 }
  0x20   : > { %366 = vst.msk [vmem:[#allocation2 + $0xf0] sm:$0x1] %vm355_vm0, %v2826_v2  ;;  %v406_v33 = vld [vmem:[%s2927_s11 + $0x18] sm:$0xff]  ;;  %v431_v35 = vld [vmem:[%s2927_s11 + $0xe0] sm:$0xff]  ;;  %v424_v38 = vld [vmem:[%s2927_s11 + $0xa8] sm:$0xff]  ;;  %s2766_s26 = scalar_lea.hbm %s3966_s4, 512  ;;  %p2767_p1 = scmp.lt.s32.totalorder %s2761_s21, %s3966_s4 }
  0x21   : > { %367 = vst.msk [vmem:[#allocation2 + $0x108] sm:$0x1] %vm355_vm0, %v2826_v2  ;;  %v407_v40 = vld [vmem:[%s2927_s11 + $0x20] sm:$0xff]  ;;  %v432_v42 = vld [vmem:[%s2927_s11 + $0xe8] sm:$0xff]  ;;  %v417_v43 = vld [vmem:[%s2927_s11 + $0x70] sm:$0xff] }
  0x22   : > { %v2939_v4 = vld [vmem:[#allocation2 + $0x78] sm:$0xff]  ;;  %368 = vst.msk [vmem:[#allocation2 + $0x120] sm:$0x1] %vm355_vm0, %v2826_v2  ;;  %v425_v44 = vld [vmem:[%s2927_s11 + $0xb0] sm:$0xff]  ;;  %v408_v46 = vld [vmem:[%s2927_s11 + $0x28] sm:$0xff] }
  0x23   : > { %2377 = vmatmul.msk.f32.vlgmr.msra.gmra.mxu1 %vm400_vm1, %v2939_v4  ;;  %369 = vst.msk [vmem:[#allocation2 + $0x138] sm:$0x1] %vm355_vm0, %v2826_v2  ;;  %v433_v48 = vld [vmem:[%s2927_s11 + $0xf0] sm:$0xff]  ;;  %v418_v50 = vld [vmem:[%s2927_s11 + $0x78] sm:$0xff]  ;;  %v392_v56 = vld [vmem:[%s331_s22] sm:$0xff] }
  0x24   : > { %370 = vst.msk [vmem:[#allocation2 + $0x150] sm:$0x1] %vm355_vm0, %v2826_v2  ;;  %v426_v51 = vld [vmem:[%s2927_s11 + $0xb8] sm:$0xff]  ;;  %v409_v53 = vld [vmem:[%s2927_s11 + $0x30] sm:$0xff]  ;;  %v398_v58 = vmul.f32 0.0, %v392_v56  ;;  %v393_v63 = vld [vmem:[%s331_s22 + $0x8] sm:$0xff]  ;;  %1460 = vmatpush.msra.mxu1 %v2536_v7 }
  0x25   : > { %371 = vst.msk [vmem:[#allocation2 + $0x168] sm:$0x1] %vm355_vm0, %v2826_v2  ;;  %v434_v54 = vld [vmem:[%s2927_s11 + $0xf8] sm:$0xff]  ;;  %v399_v1 = vmul.f32 0.0, %v393_v63  ;;  %v2570_v3 = vld [vmem:[%s3965_s3 + $0x28] sm:$0xff]  ;;  %s2762_s22 = scalar_lea.hbm %s2761_s21, 256 }
  0x26   : > { %372 = vst.msk [vmem:[#allocation2 + $0x180] sm:$0x1] %vm355_vm0, %v2826_v2  ;;  %v410_v61 = vld [vmem:[%s2927_s11 + $0x38] sm:$0xff]  ;;  %p2763_p12 = scmp.ne.s32.totalorder %s2761_s21, %s2762_s22  ;;  %p2768_p2 = scmp.lt.s32.totalorder %s2766_s26, %s2762_s22 }
  0x27   : > { %373 = vst.msk [vmem:[#allocation2 + $0x198] sm:$0x1] %vm355_vm0, %v2826_v2  ;;  %v2604_v6 = vld [vmem:[%s3965_s3 + $0x58] sm:$0xff] }
  0x28   : > { %374 = vst.msk [vmem:[#allocation2 + $0x11] sm:$0x1] %vm355_vm0, %v2826_v2  ;;  %v3261_v41 = vld [vmem:[#allocation2 + $0x79] sm:$0xff]  ;;  %p2764_p13 = pnand %p2763_p12, %p2894_p4  ;;  %p2769_p3 = por %p2768_p2, %p2767_p1 }
  0x29   : > { %375 = vst.msk [vmem:[#allocation2 + $0x29] sm:$0x1] %vm355_vm0, %v2826_v2 }
  0x2a   : > { %376 = vst.msk [vmem:[#allocation2 + $0x41] sm:$0x1] %vm355_vm0, %v2826_v2  ;;  %p2765_p0 = pneg %p2764_p13 }
  0x2b   : > { %377 = vst.msk [vmem:[#allocation2 + $0x59] sm:$0x1] %vm355_vm0, %v2826_v2 }
  0x2c   : > { %378 = vst.msk [vmem:[#allocation2 + $0x71] sm:$0x1] %vm355_vm0, %v2826_v2  ;;  %p2770_p5 = pnand %p2769_p3, %p2765_p0 }
  0x2d   : > { %379 = vst.msk [vmem:[#allocation2 + $0x89] sm:$0x1] %vm355_vm0, %v2826_v2 }
  0x2e   : > { %380 = vst.msk [vmem:[#allocation2 + $0xa1] sm:$0x1] %vm355_vm0, %v2826_v2 }
  0x2f   : > { %381 = vst.msk [vmem:[#allocation2 + $0xb9] sm:$0x1] %vm355_vm0, %v2826_v2 }
  0x30   : > { %382 = vst.msk [vmem:[#allocation2 + $0xd1] sm:$0x1] %vm355_vm0, %v2826_v2 }
  0x31   : > { %383 = vst.msk [vmem:[#allocation2 + $0xe9] sm:$0x1] %vm355_vm0, %v2826_v2 }
  0x32   : > { %384 = vst.msk [vmem:[#allocation2 + $0x101] sm:$0x1] %vm355_vm0, %v2826_v2 }
  0x33   : > { %385 = vst.msk [vmem:[#allocation2 + $0x119] sm:$0x1] %vm355_vm0, %v2826_v2 }
  0x34   : > { %386 = vst.msk [vmem:[#allocation2 + $0x131] sm:$0x1] %vm355_vm0, %v2826_v2 }
  0x35   : > { %387 = vst.msk [vmem:[#allocation2 + $0x149] sm:$0x1] %vm355_vm0, %v2826_v2 }
  0x36   : > { %388 = vst.msk [vmem:[#allocation2 + $0x161] sm:$0x1] %vm355_vm0, %v2826_v2 }
  0x37   : > { %389 = vst.msk [vmem:[#allocation2 + $0x179] sm:$0x1] %vm355_vm0, %v2826_v2 }
  0x38   : > { %390 = vst.msk [vmem:[#allocation2 + $0x191] sm:$0x1] %vm355_vm0, %v2826_v2 }
  0x39   : > { %391 = vst.msk [vmem:[#allocation2 + $0x1a9] sm:$0x1] %vm355_vm0, %v2826_v2 }
  0x3a   : > { %452 = vst.msk [vmem:[#allocation2 + $0xd9] sm:$0xff] %vm400_vm1, %v419_v9 }
  0x3b   : > { %460 = vst.msk [vmem:[#allocation2 + $0x139] sm:$0xff] %vm400_vm1, %v427_v10 }
  0x3c   : > { %445 = vst.msk [vmem:[#allocation2 + $0x81] sm:$0xff] %vm400_vm1, %v412_v11 }
  0x3d   : > { %453 = vst.msk [vmem:[#allocation2 + $0xe1] sm:$0xff] %vm400_vm1, %v420_v12  ;;  %v2638_v12 = vld [vmem:[%s3965_s3 + $0x88] sm:$0xff] }
  0x3e   : > { %436 = vst.msk [vmem:[#allocation2 + $0x19] sm:$0xff] %vm400_vm1, %v403_v13 }
  0x3f   : > { %461 = vst.msk [vmem:[#allocation2 + $0x141] sm:$0xff] %vm400_vm1, %v428_v14 }
  0x40   : > { %446 = vst.msk [vmem:[#allocation2 + $0x91] sm:$0xff] %vm400_vm1, %v413_v15 }
  0x41   : > { %v2996_v19 = vld [vmem:[#allocation2 + $0xd8] sm:$0xff]  ;;  %454 = vst.msk [vmem:[#allocation2 + $0xf1] sm:$0xff] %vm400_vm1, %v421_v16 }
  0x42   : > { %2385 = vmatmul.msk.f32.vlgmr.msra.gmra.mxu2 %vm400_vm1, %v2996_v19  ;;  %v3003_v22 = vld [vmem:[#allocation2 + $0x138] sm:$0xff]  ;;  %437 = vst.msk [vmem:[#allocation2 + $0x21] sm:$0xff] %vm400_vm1, %v404_v17 }
  0x43   : > { %2393 = vmatmul.msk.f32.vlgmr.msra.gmra.mxu3 %vm400_vm1, %v3003_v22  ;;  %v3012_v25 = vld [vmem:[#allocation2 + $0x80] sm:$0xff]  ;;  %462 = vst.msk [vmem:[#allocation2 + $0x151] sm:$0xff] %vm400_vm1, %v429_v18  ;;  %1740 = vmatpush.msra.mxu2 %v2570_v3 }
  0x44   : > { %2378 = vmatmul.msk.f32.gmra.mxu1 %vm400_vm1, %v3012_v25  ;;  %447 = vst.msk [vmem:[#allocation2 + $0x99] sm:$0xff] %vm400_vm1, %v414_v20  ;;  %v3033_v32 = vld [vmem:[#allocation2 + $0xe0] sm:$0xff]  ;;  %1894 = vmatpush.msra.mxu3 %v2604_v6  ;;  %v2603_v6 = vld [vmem:[%s3965_s3 + $0x50] sm:$0xff] }
  0x45   : > { %v3025_v29 = vld [vmem:[#allocation2 + $0x18] sm:$0xff]  ;;  %455 = vst.msk [vmem:[#allocation2 + $0xf9] sm:$0xff] %vm400_vm1, %v422_v21  ;;  %v2569_v3 = vld [vmem:[%s3965_s3 + $0x20] sm:$0xff] }
  0x46   : > { %2369 = vmatmul.msk.f32.vlgmr.msra.gmra.mxu0 %vm400_vm1, %v3025_v29  ;;  %438 = vst.msk [vmem:[#allocation2 + $0x31] sm:$0xff] %vm400_vm1, %v405_v23  ;;  %v3037_v34 = vld [vmem:[#allocation2 + $0x140] sm:$0xff]  ;;  %1741 = vmatpush.msra.mxu2 %v2569_v3 }
  0x47   : > { %463 = vst.msk [vmem:[#allocation2 + $0x159] sm:$0xff] %vm400_vm1, %v430_v28  ;;  %v3041_v36 = vld [vmem:[#allocation2 + $0x90] sm:$0xff]  ;;  %2048 = vmatpush.msra.mxu0 %v2638_v12  ;;  %v1005_v26 = vld [vmem:[#allocation2 + $0x19] sm:$0xff]  ;;  %1895 = vmatpush.msra.mxu3 %v2603_v6 }
  0x48   : > { %448 = vst.msk [vmem:[#allocation2 + $0xa9] sm:$0xff] %vm400_vm1, %v415_v30  ;;  %v3068_v45 = vld [vmem:[#allocation2 + $0xf0] sm:$0xff] }
  0x49   : > { %456 = vst.msk [vmem:[#allocation2 + $0x109] sm:$0xff] %vm400_vm1, %v423_v31  ;;  %v3051_v39 = vld [vmem:[#allocation2 + $0x20] sm:$0xff]  ;;  %v2535_v12 = vld [vmem:[%s3965_s3 + $0x70] sm:$0xff] }
  0x4a   : > { %2386 = vmatmul.msk.f32.gmra.mxu2 %vm400_vm1, %v3033_v32  ;;  %439 = vst.msk [vmem:[#allocation2 + $0x39] sm:$0xff] %vm400_vm1, %v406_v33  ;;  %v3072_v47 = vld [vmem:[#allocation2 + $0x150] sm:$0xff]  ;;  %v1006_v28 = vld [vmem:[#allocation2 + $0x21] sm:$0xff]  ;;  %1461 = vmatpush.msra.mxu1 %v2535_v12 }
  0x4b   : > { %2394 = vmatmul.msk.f32.gmra.mxu3 %vm400_vm1, %v3037_v34  ;;  %464 = vst.msk [vmem:[#allocation2 + $0x169] sm:$0xff] %vm400_vm1, %v431_v35  ;;  %v3076_v49 = vld [vmem:[#allocation2 + $0x98] sm:$0xff] }
  0x4c   : > { %2379 = vmatmul.msk.f32.gmra.mxu1 %vm400_vm1, %v3041_v36  ;;  %449 = vst.msk [vmem:[#allocation2 + $0xb1] sm:$0xff] %vm400_vm1, %v416_v37  ;;  %v3102_v55 = vld [vmem:[#allocation2 + $0xf8] sm:$0xff] }
  0x4d   : > { %457 = vst.msk [vmem:[#allocation2 + $0x111] sm:$0xff] %vm400_vm1, %v424_v38  ;;  %v3086_v52 = vld [vmem:[#allocation2 + $0x30] sm:$0xff] }
  0x4e   : > { %2370 = vmatmul.msk.f32.gmra.mxu0 %vm400_vm1, %v3051_v39  ;;  %440 = vst.msk [vmem:[#allocation2 + $0x49] sm:$0xff] %vm400_vm1, %v407_v40  ;;  %v3105_v57 = vld [vmem:[#allocation2 + $0x158] sm:$0xff] }
  0x4f   : > { %465 = vst.msk [vmem:[#allocation2 + $0x171] sm:$0xff] %vm400_vm1, %v432_v42  ;;  %v3107_v59 = vld [vmem:[#allocation2 + $0xa8] sm:$0xff]  ;;  %v3201_v30 = vld [vmem:[#allocation2 + $0x31] sm:$0xff] }
  0x50   : > { %450 = vst.msk [vmem:[#allocation2 + $0xc1] sm:$0xff] %vm400_vm1, %v417_v43  ;;  %v3122_v62 = vld [vmem:[#allocation2 + $0x108] sm:$0xff] }
  0x51   : > { %458 = vst.msk [vmem:[#allocation2 + $0x121] sm:$0xff] %vm400_vm1, %v425_v44  ;;  %v3114_v60 = vld [vmem:[#allocation2 + $0x38] sm:$0xff] }
  0x52   : > { %2387 = vmatmul.msk.f32.gmra.mxu2 %vm400_vm1, %v3068_v45  ;;  %441 = vst.msk [vmem:[#allocation2 + $0x51] sm:$0xff] %vm400_vm1, %v408_v46  ;;  %v3124_v0 = vld [vmem:[#allocation2 + $0x168] sm:$0xff] }
  0x53   : > { %2395 = vmatmul.msk.f32.gmra.mxu3 %vm400_vm1, %v3072_v47  ;;  %466 = vst.msk [vmem:[#allocation2 + $0x181] sm:$0xff] %vm400_vm1, %v433_v48  ;;  %v3126_v2 = vld [vmem:[#allocation2 + $0xb0] sm:$0xff]  ;;  %v3278_v48 = vld [vmem:[#allocation2 + $0x81] sm:$0xff] }
  0x54   : > { %2380 = vmatmul.msk.f32.gmra.mxu1 %vm400_vm1, %v3076_v49  ;;  %451 = vst.msk [vmem:[#allocation2 + $0xc9] sm:$0xff] %vm400_vm1, %v418_v50  ;;  %v3148_v8 = vld [vmem:[#allocation2 + $0x110] sm:$0xff] }
  0x55   : > { %459 = vst.msk [vmem:[#allocation2 + $0x129] sm:$0xff] %vm400_vm1, %v426_v51  ;;  %v3136_v5 = vld [vmem:[#allocation2 + $0x48] sm:$0xff] }
  0x56   : > { %2371 = vmatmul.msk.f32.gmra.mxu0 %vm400_vm1, %v3086_v52  ;;  %442 = vst.msk [vmem:[#allocation2 + $0x61] sm:$0xff] %vm400_vm1, %v409_v53  ;;  %v3150_v9 = vld [vmem:[#allocation2 + $0x170] sm:$0xff] }
  0x57   : > { %467 = vst.msk [vmem:[#allocation2 + $0x189] sm:$0xff] %vm400_vm1, %v434_v54  ;;  %v3152_v10 = vld [vmem:[#allocation2 + $0xc0] sm:$0xff]  ;;  %v3218_v31 = vld [vmem:[#allocation2 + $0x49] sm:$0xff]  ;;  %v3296_v54 = vld [vmem:[#allocation2 + $0x91] sm:$0xff] }
  0x58   : > { %401 = vst.msk [vmem:[#allocation2 + $0x1] sm:$0xff] %vm400_vm1, %v398_v58  ;;  %v3164_v13 = vld [vmem:[#allocation2 + $0x120] sm:$0xff] }
  0x59   : > { %443 = vst.msk [vmem:[#allocation2 + $0x69] sm:$0xff] %vm400_vm1, %v410_v61  ;;  %v487_v11 = vld [vmem:[#allocation2 + $0x50] sm:$0xff]  ;;  %v3314_v61 = vld [vmem:[#allocation2 + $0x99] sm:$0xff] }
  0x5a   : > { %2388 = vmatmul.msk.f32.gmra.mxu2 %vm400_vm1, %v3102_v55  ;;  %402 = vst.msk [vmem:[#allocation2 + $0x9] sm:$0xff] %vm400_vm1, %v399_v1  ;;  %v3166_v14 = vld [vmem:[#allocation2 + $0x180] sm:$0xff]  ;;  %v3227_v33 = vld [vmem:[#allocation2 + $0x51] sm:$0xff] }
  0x5b   : > { %2396 = vmatmul.msk.f32.gmra.mxu3 %vm400_vm1, %v3105_v57  ;;  %v3168_v15 = vld [vmem:[#allocation2 + $0xc8] sm:$0xff]  ;;  %3974 = vst [vmem:[#allocation8_spill] sm:$0xff] %v3314_v61 }
  0x5c   : > { %2381 = vmatmul.msk.f32.gmra.mxu1 %vm400_vm1, %v3107_v59  ;;  %v3177_v17 = vld [vmem:[#allocation2 + $0x128] sm:$0xff] }
  0x5d   : > { %v488_v16 = vld [vmem:[#allocation2 + $0x60] sm:$0xff] }
  0x5e   : > { %2372 = vmatmul.msk.f32.gmra.mxu0 %vm400_vm1, %v3114_v60  ;;  %v3179_v18 = vld [vmem:[#allocation2 + $0x188] sm:$0xff] }
  0x5f   : > { %v480_v20 = vld [vmem:[#allocation2] sm:$0xff] }
  0x60   : > { %v489_v21 = vld [vmem:[#allocation2 + $0x68] sm:$0xff] }
  0x61   : > { %v1003_v23 = vld [vmem:[#allocation2 + $0x1] sm:$0xff]  ;;  %v1004_v27 = vld [vmem:[#allocation2 + $0x9] sm:$0xff] }
  0x62   : > { %2389 = vmatmul.msk.f32.gmra.mxu2 %vm400_vm1, %v3122_v62  ;;  %v481_v24 = vld [vmem:[#allocation2 + $0x8] sm:$0xff] }
  0x63   : > { %2397 = vmatmul.msk.f32.gmra.mxu3 %vm400_vm1, %v3124_v0  ;;  %v3237_v35 = vld [vmem:[#allocation2 + $0x61] sm:$0xff]  ;;  %v3248_v38 = vld [vmem:[#allocation2 + $0x69] sm:$0xff] }
  0x64   : > { %2382 = vmatmul.msk.f32.gmra.mxu1 %vm400_vm1, %v3126_v2 }
  0x66   : > { %2373 = vmatmul.msk.f32.gmra.mxu0 %vm400_vm1, %v3136_v5 }
  0x6a   : > { %2390 = vmatmul.msk.f32.gmra.mxu2 %vm400_vm1, %v3148_v8 }
  0x6b   : > { %2398 = vmatmul.msk.f32.gmra.mxu3 %vm400_vm1, %v3150_v9 }
  0x6c   : > { %2383 = vmatmul.msk.f32.gmra.mxu1 %vm400_vm1, %v3152_v10 }
  0x6e   : > { %2374 = vmatmul.msk.f32.gmra.mxu0 %vm400_vm1, %v487_v11 }
  0x72   : > { %2391 = vmatmul.msk.f32.gmra.mxu2 %vm400_vm1, %v3164_v13 }
  0x73   : > { %2399 = vmatmul.msk.f32.gmra.mxu3 %vm400_vm1, %v3166_v14 }
  0x74   : > { %2384 = vmatmul.msk.f32.gmra.mxu1 %vm400_vm1, %v3168_v15 }
  0x76   : > { %2375 = vmatmul.msk.f32.gmra.mxu0 %vm400_vm1, %v488_v16 }
  0x7a   : > { %2392 = vmatmul.msk.f32.gmra.mxu2 %vm400_vm1, %v3177_v17 }
  0x7b   : > { %2400 = vmatmul.msk.f32.gmra.mxu3 %vm400_vm1, %v3179_v18 }
  0x7c   : > { %2401 = vmatmul.msk.f32.vlgmr.msrb.gmra.mxu1 %vm400_vm1, %v480_v20  ;;  %v3359_v20 = vld [vmem:[#allocation2 + $0xb1] sm:$0xff] }
  0x7d   : > { %3978 = vst [vmem:[#allocation12_spill] sm:$0xff] %v3359_v20 }
  0x7e   : > { %2376 = vmatmul.msk.f32.gmra.mxu0 %vm400_vm1, %v489_v21 }
  0x82   : > { %2435 = vmatmul.msk.f32.vlgmr.msrb.gmra.mxu2 %vm400_vm1, %v3086_v52 }
  0x83   : > { %2469 = vmatmul.msk.f32.vlgmr.msrb.gmra.mxu3 %vm400_vm1, %v1003_v23 }
  0x84   : > { %2402 = vmatmul.msk.f32.gmra.mxu1 %vm400_vm1, %v481_v24 }
  0x86   : > { %2503 = vmatmul.msk.f32.vlgmr.msrb.gmra.mxu0 %vm400_vm1, %v1005_v26 }
  0x8a   : > { %2436 = vmatmul.msk.f32.gmra.mxu2 %vm400_vm1, %v3114_v60 }
  0x8b   : > { %2470 = vmatmul.msk.f32.gmra.mxu3 %vm400_vm1, %v1004_v27 }
  0x8c   : > { %2403 = vmatmul.msk.f32.gmra.mxu1 %vm400_vm1, %v3025_v29  ;;  %v3209_v29 = vld [vmem:[#allocation2 + $0x39] sm:$0xff] }
  0x8e   : > { %2504 = vmatmul.msk.f32.gmra.mxu0 %vm400_vm1, %v1006_v28 }
  0x92   : > { %2437 = vmatmul.msk.f32.gmra.mxu2 %vm400_vm1, %v3136_v5 }
  0x93   : > { %2471 = vmatmul.msk.f32.gmra.mxu3 %vm400_vm1, %v1005_v26 }
  0x94   : > { %2404 = vmatmul.msk.f32.gmra.mxu1 %vm400_vm1, %v3051_v39 }
  0x96   : > { %2505 = vmatmul.msk.f32.gmra.mxu0 %vm400_vm1, %v3201_v30 }
  0x9a   : > { %2438 = vmatmul.msk.f32.gmra.mxu2 %vm400_vm1, %v487_v11 }
  0x9b   : > { %2472 = vmatmul.msk.f32.gmra.mxu3 %vm400_vm1, %v1006_v28  ;;  %v3380_v28 = vld [vmem:[#allocation2 + $0xc1] sm:$0xff] }
  0x9c   : > { %2405 = vmatmul.msk.f32.gmra.mxu1 %vm400_vm1, %v3086_v52 }
  0x9e   : > { %2506 = vmatmul.msk.f32.gmra.mxu0 %vm400_vm1, %v3209_v29 }
  0xa0   : > { %v3242_v37 = vpop.f32.mrf.mxu1 }
  0xa2   : > { %2439 = vmatmul.msk.f32.gmra.mxu2 %vm400_vm1, %v488_v16 }
  0xa3   : > { %2473 = vmatmul.msk.f32.gmra.mxu3 %vm400_vm1, %v3201_v30 }
  0xa4   : > { %2406 = vmatmul.msk.f32.gmra.mxu1 %vm400_vm1, %v3114_v60 }
  0xa6   : > { %2507 = vmatmul.msk.f32.gmra.mxu0 %vm400_vm1, %v3218_v31 }
  0xaa   : > { %2440 = vmatmul.msk.f32.gmra.mxu2 %vm400_vm1, %v489_v21 }
  0xab   : > { %2474 = vmatmul.msk.f32.gmra.mxu3 %vm400_vm1, %v3209_v29 }
  0xac   : > { %2407 = vmatmul.msk.f32.gmra.mxu1 %vm400_vm1, %v3136_v5  ;;  %v3335_v5 = vld [vmem:[#allocation2 + $0xa9] sm:$0xff] }
  0xad   : > { %3976 = vst [vmem:[#allocation10_spill] sm:$0xff] %v3335_v5 }
  0xae   : > { %2508 = vmatmul.msk.f32.gmra.mxu0 %vm400_vm1, %v3227_v33 }
  0xb2   : > { %2441 = vmatmul.msk.f32.gmra.mxu2 %vm400_vm1, %v2939_v4 }
  0xb3   : > { %2475 = vmatmul.msk.f32.gmra.mxu3 %vm400_vm1, %v3218_v31 }
  0xb4   : > { %2408 = vmatmul.msk.f32.gmra.mxu1 %vm400_vm1, %v487_v11 }
  0xb6   : > { %2509 = vmatmul.msk.f32.gmra.mxu0 %vm400_vm1, %v3237_v35 }
  0xba   : > { %2442 = vmatmul.msk.f32.gmra.mxu2 %vm400_vm1, %v3012_v25 }
  0xbb   : > { %2476 = vmatmul.msk.f32.gmra.mxu3 %vm400_vm1, %v3227_v33 }
  0xbc   : > { %2409 = vmatmul.msk.f32.gmra.mxu1 %vm400_vm1, %v488_v16 }
  0xbe   : > { %2510 = vmatmul.msk.f32.gmra.mxu0 %vm400_vm1, %v3248_v38 }
  0xc1   : > { %v3253_v39 = vpop.f32.mrf.mxu1 }
  0xc2   : > { %2443 = vmatmul.msk.f32.gmra.mxu2 %vm400_vm1, %v3041_v36 }
  0xc3   : > { %2477 = vmatmul.msk.f32.gmra.mxu3 %vm400_vm1, %v3237_v35  ;;  %v3259_v40 = vpop.f32.mrf.mxu0 }
  0xc4   : > { %2410 = vmatmul.msk.f32.gmra.mxu1 %vm400_vm1, %v489_v21  ;;  %v2637_v21 = vld [vmem:[%s3965_s3 + $0x80] sm:$0xff] }
  0xc5   : > { %v3264_v42 = vpop.f32.mrf.mxu2  ;;  %2049 = vmatpush.msra.mxu0 %v2637_v21  ;;  %v3396_v21 = vld [vmem:[#allocation2 + $0xc9] sm:$0xff] }
  0xc6   : > { %v3266_v43 = vpop.f32.mrf.mxu3  ;;  %2511 = vmatmul.msk.f32.gmra.mxu0 %vm400_vm1, %v3261_v41 }
  0xc9   : > { %v3270_v44 = vpop.f32.mrf.mxu1 }
  0xca   : > { %2444 = vmatmul.msk.f32.gmra.mxu2 %vm400_vm1, %v3076_v49 }
  0xcb   : > { %2478 = vmatmul.msk.f32.gmra.mxu3 %vm400_vm1, %v3248_v38  ;;  %v3276_v46 = vpop.f32.mrf.mxu0 }
  0xcc   : > { %2411 = vmatmul.msk.f32.gmra.mxu1 %vm400_vm1, %v2939_v4 }
  0xcd   : > { %v3282_v50 = vpop.f32.mrf.mxu2 }
  0xce   : > { %v3284_v51 = vpop.f32.mrf.mxu3  ;;  %2512 = vmatmul.msk.f32.gmra.mxu0 %vm400_vm1, %v3278_v48 }
  0xcf   : > { %3972 = vst [vmem:[#allocation6_spill] sm:$0xff] %v3284_v51 }
  0xd1   : > { %v3288_v52 = vpop.f32.mrf.mxu1 }
  0xd2   : > { %2445 = vmatmul.msk.f32.gmra.mxu2 %vm400_vm1, %v3107_v59 }
  0xd3   : > { %2479 = vmatmul.msk.f32.gmra.mxu3 %vm400_vm1, %v3261_v41  ;;  %v3294_v53 = vpop.f32.mrf.mxu0 }
  0xd4   : > { %2412 = vmatmul.msk.f32.gmra.mxu1 %vm400_vm1, %v3012_v25 }
  0xd5   : > { %v3300_v4 = vpop.f32.mrf.mxu2 }
  0xd6   : > { %v3302_v56 = vpop.f32.mrf.mxu3  ;;  %2513 = vmatmul.msk.f32.gmra.mxu0 %vm400_vm1, %v3296_v54 }
  0xd7   : > { %3973 = vst [vmem:[#allocation7_spill] sm:$0xff] %v3302_v56 }
  0xd9   : > { %v3306_v58 = vpop.f32.mrf.mxu1 }
  0xda   : > { %2446 = vmatmul.msk.f32.gmra.mxu2 %vm400_vm1, %v3126_v2 }
  0xdb   : > { %2480 = vmatmul.msk.f32.gmra.mxu3 %vm400_vm1, %v3278_v48  ;;  %v3312_v60 = vpop.f32.mrf.mxu0 }
  0xdc   : > { %2413 = vmatmul.msk.f32.gmra.mxu1 %vm400_vm1, %v3041_v36 }
  0xdd   : > { %v3318_v25 = vpop.f32.mrf.mxu2 }
  0xde   : > { %v3320_v63 = vpop.f32.mrf.mxu3  ;;  %2514 = vmatmul.msk.f32.gmra.mxu0 %vm400_vm1, %v3314_v61 }
  0xdf   : > { %3975 = vst [vmem:[#allocation9_spill] sm:$0xff] %v3320_v63  ;;  %v3410_v63 = vld [vmem:[#allocation2 + $0xd9] sm:$0xff] }
  0xe1   : > { %v3324_v1 = vpop.f32.mrf.mxu1 }
  0xe2   : > { %2447 = vmatmul.msk.f32.gmra.mxu2 %vm400_vm1, %v3152_v10 }
  0xe3   : > { %2481 = vmatmul.msk.f32.gmra.mxu3 %vm400_vm1, %v3296_v54  ;;  %v3333_v36 = vpop.f32.mrf.mxu0 }
  0xe4   : > { %2414 = vmatmul.msk.f32.gmra.mxu1 %vm400_vm1, %v3076_v49 }
  0xe5   : > { %v3342_v7 = vpop.f32.mrf.mxu2 }
  0xe6   : > { %v3344_v11 = vpop.f32.mrf.mxu3  ;;  %2515 = vmatmul.msk.f32.gmra.mxu0 %vm400_vm1, %v3335_v5 }
  0xe7   : > { %3977 = vst [vmem:[#allocation11_spill] sm:$0xff] %v3344_v11 }
  0xe9   : > { %v3351_v16 = vpop.f32.mrf.mxu1 }
  0xea   : > { %2448 = vmatmul.msk.f32.gmra.mxu2 %vm400_vm1, %v3168_v15 }
  0xeb   : > { %2482 = vmatmul.msk.f32.gmra.mxu3 %vm400_vm1, %v3314_v61  ;;  %v3357_v49 = vpop.f32.mrf.mxu0 }
  0xec   : > { %2415 = vmatmul.msk.f32.gmra.mxu1 %vm400_vm1, %v3107_v59 }
  0xed   : > { %v3366_v23 = vpop.f32.mrf.mxu2 }
  0xee   : > { %v3368_v24 = vpop.f32.mrf.mxu3  ;;  %2516 = vmatmul.msk.f32.gmra.mxu0 %vm400_vm1, %v3359_v20 }
  0xef   : > { %3979 = vst [vmem:[#allocation13_spill] sm:$0xff] %v3368_v24 }
  0xf1   : > { %v3372_v26 = vpop.f32.mrf.mxu1 }
  0xf2   : > { %2449 = vmatmul.msk.f32.gmra.mxu2 %vm400_vm1, %v2996_v19 }
  0xf3   : > { %2483 = vmatmul.msk.f32.gmra.mxu3 %vm400_vm1, %v3335_v5  ;;  %v3378_v27 = vpop.f32.mrf.mxu0 }
  0xf4   : > { %2416 = vmatmul.msk.f32.gmra.mxu1 %vm400_vm1, %v3126_v2 }
  0xf5   : > { %v3384_v59 = vpop.f32.mrf.mxu2 }
  0xf6   : > { %v3386_v3 = vpop.f32.mrf.mxu3  ;;  %2517 = vmatmul.msk.f32.gmra.mxu0 %vm400_vm1, %v3380_v28 }
  0xf7   : > { %3980 = vst [vmem:[#allocation14_spill] sm:$0xff] %v3386_v3 }
  0xf9   : > { %v753_v6 = vpop.f32.mrf.mxu1 }
  0xfa   : > { %2450 = vmatmul.msk.f32.gmra.mxu2 %vm400_vm1, %v3033_v32 }
  0xfb   : > { %2484 = vmatmul.msk.f32.gmra.mxu3 %vm400_vm1, %v3359_v20  ;;  %v3394_v12 = vpop.f32.mrf.mxu0  ;;  %v754_v20 = vadd.f32 %v753_v6, %v3259_v40  ;;  %v3423_v6 = vld [vmem:[#allocation2 + $0xe1] sm:$0xff] }
  0xfc   : > { %2417 = vmatmul.msk.f32.gmra.mxu1 %vm400_vm1, %v3152_v10 }
  0xfd   : > { %v3400_v2 = vpop.f32.mrf.mxu2 }
  0xfe   : > { %v3402_v3 = vpop.f32.mrf.mxu3  ;;  %2518 = vmatmul.msk.f32.gmra.mxu0 %vm400_vm1, %v3396_v21 }
  0xff   : > { %3981 = vst [vmem:[#allocation15_spill] sm:$0xff] %v3402_v3 }
 0x101   : > { %v756_v24 = vpop.f32.mrf.mxu1 }
 0x102   : > { %2451 = vmatmul.msk.f32.gmra.mxu2 %vm400_vm1, %v3068_v45 }
 0x103   : > { %2485 = vmatmul.msk.f32.gmra.mxu3 %vm400_vm1, %v3380_v28  ;;  %v1309_v11 = vpop.f32.mrf.mxu0 }
 0x104   : > { %2418 = vmatmul.msk.f32.gmra.mxu1 %vm400_vm1, %v3168_v15  ;;  %v757_v15 = vadd.f32 %v756_v24, %v3276_v46  ;;  %v3436_v24 = vld [vmem:[#allocation2 + $0xf1] sm:$0xff] }
 0x105   : > { %v875_v10 = vpop.f32.mrf.mxu2 }
 0x106   : > { %v971_v3 = vadd.f32 %v875_v10, %v754_v20  ;;  %v1155_v56 = vpop.f32.mrf.mxu3  ;;  %2519 = vmatmul.msk.f32.gmra.mxu0 %vm400_vm1, %v3410_v63 }
 0x108   : > { %v1251_v5 = vadd.f32 %v1155_v56, %v971_v3 }
 0x109   : > { %v759_v51 = vpop.f32.mrf.mxu1 }
 0x10a   : > { %v3417_v61 = vadd.f32 %v1309_v11, %v1251_v5  ;;  %2452 = vmatmul.msk.f32.gmra.mxu2 %vm400_vm1, %v3102_v55 }
 0x10b   : > { %2486 = vmatmul.msk.f32.gmra.mxu3 %vm400_vm1, %v3396_v21  ;;  %v1312_v40 = vpop.f32.mrf.mxu0 }
 0x10c   : > { %2419 = vmatmul.msk.f32.gmra.mxu1 %vm400_vm1, %v2996_v19  ;;  %v760_v19 = vadd.f32 %v759_v51, %v3294_v53  ;;  %v3449_v53 = vld [vmem:[#allocation2 + $0xf9] sm:$0xff] }
 0x10d   : > { %v878_v20 = vpop.f32.mrf.mxu2 }
 0x10e   : > { %v972_v10 = vadd.f32 %v878_v20, %v757_v15  ;;  %v1158_v56 = vpop.f32.mrf.mxu3  ;;  %2520 = vmatmul.msk.f32.gmra.mxu0 %vm400_vm1, %v3423_v6 }
 0x110   : > { %v1252_v5 = vadd.f32 %v1158_v56, %v972_v10 }
 0x111   : > { %v762_v11 = vpop.f32.mrf.mxu1 }
 0x112   : > { %v3430_v3 = vadd.f32 %v1312_v40, %v1252_v5  ;;  %2453 = vmatmul.msk.f32.gmra.mxu2 %vm400_vm1, %v3122_v62 }
 0x113   : > { %2487 = vmatmul.msk.f32.gmra.mxu3 %vm400_vm1, %v3410_v63  ;;  %v1315_v46 = vpop.f32.mrf.mxu0 }
 0x114   : > { %2420 = vmatmul.msk.f32.gmra.mxu1 %vm400_vm1, %v3033_v32  ;;  %v763_v32 = vadd.f32 %v762_v11, %v3312_v60  ;;  %v3462_v11 = vld [vmem:[#allocation2 + $0x109] sm:$0xff] }
 0x115   : > { %v881_v15 = vpop.f32.mrf.mxu2 }
 0x116   : > { %v973_v20 = vadd.f32 %v881_v15, %v760_v19  ;;  %v1161_v10 = vpop.f32.mrf.mxu3  ;;  %2521 = vmatmul.msk.f32.gmra.mxu0 %vm400_vm1, %v3436_v24 }
 0x118   : > { %v1253_v40 = vadd.f32 %v1161_v10, %v973_v20 }
 0x119   : > { %v765_v56 = vpop.f32.mrf.mxu1 }
 0x11a   : > { %v3443_v5 = vadd.f32 %v1315_v46, %v1253_v40  ;;  %2454 = vmatmul.msk.f32.gmra.mxu2 %vm400_vm1, %v3148_v8 }
 0x11b   : > { %2488 = vmatmul.msk.f32.gmra.mxu3 %vm400_vm1, %v3423_v6  ;;  %v1318_v51 = vpop.f32.mrf.mxu0 }
 0x11c   : > { %2421 = vmatmul.msk.f32.gmra.mxu1 %vm400_vm1, %v3068_v45  ;;  %v766_v45 = vadd.f32 %v765_v56, %v3333_v36  ;;  %v3475_v56 = vld [vmem:[#allocation2 + $0x111] sm:$0xff] }
 0x11d   : > { %v884_v19 = vpop.f32.mrf.mxu2 }
 0x11e   : > { %v974_v15 = vadd.f32 %v884_v19, %v763_v32  ;;  %v1164_v20 = vpop.f32.mrf.mxu3  ;;  %2522 = vmatmul.msk.f32.gmra.mxu0 %vm400_vm1, %v3449_v53 }
 0x120   : > { %v1254_v46 = vadd.f32 %v1164_v20, %v974_v15 }
 0x121   : > { %v768_v10 = vpop.f32.mrf.mxu1 }
 0x122   : > { %v3456_v40 = vadd.f32 %v1318_v51, %v1254_v46  ;;  %2455 = vmatmul.msk.f32.gmra.mxu2 %vm400_vm1, %v3164_v13 }
 0x123   : > { %2489 = vmatmul.msk.f32.gmra.mxu3 %vm400_vm1, %v3436_v24  ;;  %v1321_v60 = vpop.f32.mrf.mxu0 }
 0x124   : > { %2422 = vmatmul.msk.f32.gmra.mxu1 %vm400_vm1, %v3102_v55  ;;  %v769_v55 = vadd.f32 %v768_v10, %v3357_v49  ;;  %v3488_v10 = vld [vmem:[#allocation2 + $0x121] sm:$0xff] }
 0x125   : > { %v887_v32 = vpop.f32.mrf.mxu2 }
 0x126   : > { %v975_v19 = vadd.f32 %v887_v32, %v766_v45  ;;  %v1167_v15 = vpop.f32.mrf.mxu3  ;;  %2523 = vmatmul.msk.f32.gmra.mxu0 %vm400_vm1, %v3462_v11 }
 0x128   : > { %v1255_v51 = vadd.f32 %v1167_v15, %v975_v19 }
 0x129   : > { %v771_v20 = vpop.f32.mrf.mxu1 }
 0x12a   : > { %v3469_v46 = vadd.f32 %v1321_v60, %v1255_v51  ;;  %2456 = vmatmul.msk.f32.gmra.mxu2 %vm400_vm1, %v3177_v17 }
 0x12b   : > { %2490 = vmatmul.msk.f32.gmra.mxu3 %vm400_vm1, %v3449_v53  ;;  %v1324_v36 = vpop.f32.mrf.mxu0 }
 0x12c   : > { %2423 = vmatmul.msk.f32.gmra.mxu1 %vm400_vm1, %v3122_v62  ;;  %v772_v62 = vadd.f32 %v771_v20, %v3378_v27  ;;  %v3501_v20 = vld [vmem:[#allocation2 + $0x129] sm:$0xff] }
 0x12d   : > { %v890_v45 = vpop.f32.mrf.mxu2 }
 0x12e   : > { %v976_v32 = vadd.f32 %v890_v45, %v769_v55  ;;  %v1170_v19 = vpop.f32.mrf.mxu3  ;;  %2524 = vmatmul.msk.f32.gmra.mxu0 %vm400_vm1, %v3475_v56 }
 0x130   : > { %v1256_v60 = vadd.f32 %v1170_v19, %v976_v32 }
 0x131   : > { %v774_v15 = vpop.f32.mrf.mxu1 }
 0x132   : > { %v3482_v51 = vadd.f32 %v1324_v36, %v1256_v60  ;;  %2457 = vmatmul.msk.f32.gmra.mxu2 %vm400_vm1, %v3003_v22 }
 0x133   : > { %2491 = vmatmul.msk.f32.gmra.mxu3 %vm400_vm1, %v3462_v11  ;;  %v1327_v49 = vpop.f32.mrf.mxu0 }
 0x134   : > { %2424 = vmatmul.msk.f32.gmra.mxu1 %vm400_vm1, %v3148_v8  ;;  %v775_v8 = vadd.f32 %v774_v15, %v3394_v12  ;;  %v3515_v15 = vld [vmem:[#allocation2 + $0x139] sm:$0xff] }
 0x135   : > { %v893_v55 = vpop.f32.mrf.mxu2 }
 0x136   : > { %v977_v45 = vadd.f32 %v893_v55, %v772_v62  ;;  %v1173_v32 = vpop.f32.mrf.mxu3  ;;  %2525 = vmatmul.msk.f32.gmra.mxu0 %vm400_vm1, %v3488_v10 }
 0x138   : > { %v1257_v36 = vadd.f32 %v1173_v32, %v977_v45 }
 0x139   : > { %v777_v19 = vpop.f32.mrf.mxu1 }
 0x13a   : > { %v3495_v60 = vadd.f32 %v1327_v49, %v1257_v36  ;;  %2458 = vmatmul.msk.f32.gmra.mxu2 %vm400_vm1, %v3037_v34 }
 0x13b   : > { %2492 = vmatmul.msk.f32.gmra.mxu3 %vm400_vm1, %v3475_v56  ;;  %v1330_v27 = vpop.f32.mrf.mxu0 }
 0x13c   : > { %3982 = vst [vmem:[#allocation16_spill] sm:$0xff] %v3495_v60  ;;  %2425 = vmatmul.msk.f32.gmra.mxu1 %vm400_vm1, %v3164_v13  ;;  %v778_v13 = vadd.f32 %v777_v19, %v3242_v37  ;;  %v3532_v37 = vld [vmem:[#allocation2 + $0x141] sm:$0xff] }
 0x13d   : > { %v896_v62 = vpop.f32.mrf.mxu2 }
 0x13e   : > { %v978_v55 = vadd.f32 %v896_v62, %v775_v8  ;;  %v1176_v45 = vpop.f32.mrf.mxu3  ;;  %2526 = vmatmul.msk.f32.gmra.mxu0 %vm400_vm1, %v3501_v20 }
 0x140   : > { %v1258_v49 = vadd.f32 %v1176_v45, %v978_v55  ;;  %v468_v55 = vld [vmem:[%s348_s8] sm:$0xff] }
 0x141   : > { %v780_v32 = vpop.f32.mrf.mxu1 }
 0x142   : > { %v3509_v36 = vadd.f32 %v1330_v27, %v1258_v49  ;;  %2459 = vmatmul.msk.f32.gmra.mxu2 %vm400_vm1, %v3072_v47  ;;  %v475_v49 = vmul.f32 0.0, %v468_v55  ;;  %v781_v19 = vadd.f32 %v780_v32, %v3253_v39  ;;  %v3546_v39 = vld [vmem:[#allocation2 + $0x151] sm:$0xff] }
 0x143   : > { %2493 = vmatmul.msk.f32.gmra.mxu3 %vm400_vm1, %v3488_v10  ;;  %v1333_v12 = vpop.f32.mrf.mxu0 }
 0x144   : > { %3983 = vst [vmem:[#allocation17_spill] sm:$0xff] %v3509_v36  ;;  %2426 = vmatmul.msk.f32.gmra.mxu1 %vm400_vm1, %v3177_v17 }
 0x145   : > { %v899_v27 = vpop.f32.mrf.mxu2  ;;  %478 = vst.msk [vmem:[#allocation2 + $0x199] sm:$0xff] %vm400_vm1, %v475_v49 }
 0x146   : > { %v979_v8 = vadd.f32 %v899_v27, %v778_v13  ;;  %v1179_v62 = vpop.f32.mrf.mxu3  ;;  %2527 = vmatmul.msk.f32.gmra.mxu0 %vm400_vm1, %v3515_v15 }
 0x148   : > { %v1259_v45 = vadd.f32 %v1179_v62, %v979_v8  ;;  %v469_v8 = vld [vmem:[%s348_s8 + $0x8] sm:$0xff] }
 0x149   : > { %v783_v36 = vpop.f32.mrf.mxu1  ;;  %v476_v55 = vmul.f32 0.0, %v469_v8 }
 0x14a   : > { %v3525_v60 = vadd.f32 %v1333_v12, %v1259_v45  ;;  %2460 = vmatmul.msk.f32.gmra.mxu2 %vm400_vm1, %v3105_v57  ;;  %v784_v32 = vadd.f32 %v783_v36, %v3270_v44  ;;  %v3559_v36 = vld [vmem:[#allocation2 + $0x159] sm:$0xff] }
 0x14b   : > { %2494 = vmatmul.msk.f32.gmra.mxu3 %vm400_vm1, %v3501_v20  ;;  %v1336_v17 = vpop.f32.mrf.mxu0  ;;  %479 = vst.msk [vmem:[#allocation2 + $0x1a1] sm:$0xff] %vm400_vm1, %v476_v55 }
 0x14c   : > { %2427 = vmatmul.msk.f32.gmra.mxu1 %vm400_vm1, %v3003_v22 }
 0x14d   : > { %v902_v13 = vpop.f32.mrf.mxu2 }
 0x14e   : > { %v980_v27 = vadd.f32 %v902_v13, %v781_v19  ;;  %v1182_v12 = vpop.f32.mrf.mxu3  ;;  %2528 = vmatmul.msk.f32.gmra.mxu0 %vm400_vm1, %v3532_v37 }
 0x150   : > { %v1260_v62 = vadd.f32 %v1182_v12, %v980_v27 }
 0x151   : > { %v786_v45 = vpop.f32.mrf.mxu1 }
 0x152   : > { %v3539_v49 = vadd.f32 %v1336_v17, %v1260_v62  ;;  %2461 = vmatmul.msk.f32.gmra.mxu2 %vm400_vm1, %v3124_v0 }
 0x153   : > { %2495 = vmatmul.msk.f32.gmra.mxu3 %vm400_vm1, %v3515_v15  ;;  %v1339_v22 = vpop.f32.mrf.mxu0 }
 0x154   : > { %2428 = vmatmul.msk.f32.gmra.mxu1 %vm400_vm1, %v3037_v34  ;;  %v787_v34 = vadd.f32 %v786_v45, %v3288_v52  ;;  %v3572_v45 = vld [vmem:[#allocation2 + $0x169] sm:$0xff] }
 0x155   : > { %v905_v19 = vpop.f32.mrf.mxu2 }
 0x156   : > { %v981_v13 = vadd.f32 %v905_v19, %v784_v32  ;;  %v1185_v17 = vpop.f32.mrf.mxu3  ;;  %2529 = vmatmul.msk.f32.gmra.mxu0 %vm400_vm1, %v3546_v39 }
 0x158   : > { %v1261_v27 = vadd.f32 %v1185_v17, %v981_v13 }
 0x159   : > { %v789_v12 = vpop.f32.mrf.mxu1 }
 0x15a   : > { %v3553_v8 = vadd.f32 %v1339_v22, %v1261_v27  ;;  %2462 = vmatmul.msk.f32.gmra.mxu2 %vm400_vm1, %v3150_v9 }
 0x15b   : > { %2496 = vmatmul.msk.f32.gmra.mxu3 %vm400_vm1, %v3532_v37  ;;  %v1342_v44 = vpop.f32.mrf.mxu0 }
 0x15c   : > { %2429 = vmatmul.msk.f32.gmra.mxu1 %vm400_vm1, %v3072_v47  ;;  %v790_v47 = vadd.f32 %v789_v12, %v3306_v58  ;;  %v3585_v12 = vld [vmem:[#allocation2 + $0x171] sm:$0xff] }
 0x15d   : > { %v908_v62 = vpop.f32.mrf.mxu2 }
 0x15e   : > { %v982_v55 = vadd.f32 %v908_v62, %v787_v34  ;;  %v1188_v32 = vpop.f32.mrf.mxu3  ;;  %2530 = vmatmul.msk.f32.gmra.mxu0 %vm400_vm1, %v3559_v36 }
 0x160   : > { %v1262_v22 = vadd.f32 %v1188_v32, %v982_v55 }
 0x161   : > { %v792_v19 = vpop.f32.mrf.mxu1 }
 0x162   : > { %v3566_v13 = vadd.f32 %v1342_v44, %v1262_v22  ;;  %2463 = vmatmul.msk.f32.gmra.mxu2 %vm400_vm1, %v3166_v14 }
 0x163   : > { %2497 = vmatmul.msk.f32.gmra.mxu3 %vm400_vm1, %v3546_v39  ;;  %v1345_v52 = vpop.f32.mrf.mxu0 }
 0x164   : > { %2430 = vmatmul.msk.f32.gmra.mxu1 %vm400_vm1, %v3105_v57  ;;  %v793_v57 = vadd.f32 %v792_v19, %v3324_v1  ;;  %v3597_v19 = vld [vmem:[#allocation2 + $0x181] sm:$0xff] }
 0x165   : > { %v911_v17 = vpop.f32.mrf.mxu2 }
 0x166   : > { %v983_v27 = vadd.f32 %v911_v17, %v790_v47  ;;  %v1191_v34 = vpop.f32.mrf.mxu3  ;;  %2531 = vmatmul.msk.f32.gmra.mxu0 %vm400_vm1, %v3572_v45 }
 0x168   : > { %v1263_v44 = vadd.f32 %v1191_v34, %v983_v27 }
 0x169   : > { %v795_v62 = vpop.f32.mrf.mxu1 }
 0x16a   : > { %v3579_v14 = vadd.f32 %v1345_v52, %v1263_v44  ;;  %2464 = vmatmul.msk.f32.gmra.mxu2 %vm400_vm1, %v3179_v18  ;;  %v514_v52 = vld [vmem:[#allocation2 + $0x198] sm:$0xff] }
 0x16b   : > { %2498 = vmatmul.msk.f32.gmra.mxu3 %vm400_vm1, %v3559_v36  ;;  %v1348_v58 = vpop.f32.mrf.mxu0 }
 0x16c   : > { %2431 = vmatmul.msk.f32.gmra.mxu1 %vm400_vm1, %v3124_v0  ;;  %v796_v0 = vadd.f32 %v795_v62, %v3351_v16  ;;  %v3609_v62 = vld [vmem:[#allocation2 + $0x189] sm:$0xff] }
 0x16d   : > { %v914_v55 = vpop.f32.mrf.mxu2 }
 0x16e   : > { %v984_v32 = vadd.f32 %v914_v55, %v793_v57  ;;  %v1194_v22 = vpop.f32.mrf.mxu3  ;;  %2532 = vmatmul.msk.f32.gmra.mxu0 %vm400_vm1, %v3585_v12 }
 0x170   : > { %v1264_v47 = vadd.f32 %v1194_v22, %v984_v32 }
 0x171   : > { %v798_v18 = vpop.f32.mrf.mxu1 }
 0x172   : > { %v3592_v17 = vadd.f32 %v1348_v58, %v1264_v47  ;;  %2465 = vmatmul.msk.f32.gmra.mxu2 %vm400_vm1, %v514_v52  ;;  %v515_v58 = vld [vmem:[#allocation2 + $0x1a0] sm:$0xff] }
 0x173   : > { %2499 = vmatmul.msk.f32.gmra.mxu3 %vm400_vm1, %v3572_v45  ;;  %v1351_v1 = vpop.f32.mrf.mxu0 }
 0x174   : > { %2432 = vmatmul.msk.f32.gmra.mxu1 %vm400_vm1, %v3150_v9  ;;  %v799_v9 = vadd.f32 %v798_v18, %v3372_v26  ;;  %v1595_v18 = vld [vmem:[#allocation2 + $0x32] sm:$0xff] }
 0x175   : > { %v917_v27 = vpop.f32.mrf.mxu2 }
 0x176   : > { %v985_v34 = vadd.f32 %v917_v27, %v796_v0  ;;  %v1197_v44 = vpop.f32.mrf.mxu3  ;;  %2533 = vmatmul.msk.f32.gmra.mxu0 %vm400_vm1, %v3597_v19  ;;  %v1593_v27 = vld [vmem:[#allocation2 + $0x1a] sm:$0xff] }
 0x178   : > { %v1265_v57 = vadd.f32 %v1197_v44, %v985_v34 }
 0x179   : > { %v801_v55 = vpop.f32.mrf.mxu1 }
 0x17a   : > { %v3604_v32 = vadd.f32 %v1351_v1, %v1265_v57  ;;  %2466 = vmatmul.msk.f32.gmra.mxu2 %vm400_vm1, %v515_v58  ;;  %v1591_v1 = vld [vmem:[#allocation2 + $0x2] sm:$0xff] }
 0x17b   : > { %2500 = vmatmul.msk.f32.gmra.mxu3 %vm400_vm1, %v3585_v12  ;;  %v1354_v16 = vpop.f32.mrf.mxu0 }
 0x17c   : > { %2537 = vmatmul.msk.f32.vlgmr.msra.gmra.mxu1 %vm400_vm1, %v3201_v30  ;;  %v802_v30 = vadd.f32 %v801_v55, %v3264_v42  ;;  %v1596_v42 = vld [vmem:[#allocation2 + $0x3a] sm:$0xff] }
 0x17d   : > { %v920_v22 = vpop.f32.mrf.mxu2 }
 0x17e   : > { %v986_v52 = vadd.f32 %v920_v22, %v799_v9  ;;  %v1200_v47 = vpop.f32.mrf.mxu3  ;;  %2534 = vmatmul.msk.f32.gmra.mxu0 %vm400_vm1, %v3609_v62  ;;  %v1592_v22 = vld [vmem:[#allocation2 + $0xa] sm:$0xff] }
 0x180   : > { %v1266_v0 = vadd.f32 %v1200_v47, %v986_v52 }
 0x181   : > { %v804_v34 = vpop.f32.mrf.mxu1 }
 0x182   : > { %v3616_v44 = vadd.f32 %v1354_v16, %v1266_v0  ;;  %2571 = vmatmul.msk.f32.vlgmr.msra.gmra.mxu2 %vm400_vm1, %v1591_v1  ;;  %v1594_v16 = vld [vmem:[#allocation2 + $0x22] sm:$0xff]  ;;  %v805_v55 = vadd.f32 %v804_v34, %v3282_v50 }
 0x183   : > { %2605 = vmatmul.msk.f32.vlgmr.msra.gmra.mxu3 %vm400_vm1, %v1593_v27  ;;  %v1357_v26 = vpop.f32.mrf.mxu0 }
 0x184   : > { %2538 = vmatmul.msk.f32.gmra.mxu1 %vm400_vm1, %v3209_v29 }
 0x185   : > { %v923_v58 = vpop.f32.mrf.mxu2 }
 0x186   : > { %v987_v57 = vadd.f32 %v923_v58, %v802_v30  ;;  %v1203_v9 = vpop.f32.mrf.mxu3  ;;  %2639 = vmatmul.msk.f32.vlgmr.msra.gmra.mxu0 %vm400_vm1, %v1595_v18 }
 0x188   : > { %v1267_v52 = vadd.f32 %v1203_v9, %v987_v57 }
 0x189   : > { %v807_v47 = vpop.f32.mrf.mxu1 }
 0x18a   : > { %v3624_v0 = vadd.f32 %v1357_v26, %v1267_v52  ;;  %2572 = vmatmul.msk.f32.gmra.mxu2 %vm400_vm1, %v1592_v22  ;;  %v1597_v52 = vld [vmem:[#allocation2 + $0x4a] sm:$0xff]  ;;  %v808_v50 = vadd.f32 %v807_v47, %v3300_v4 }
 0x18b   : > { %2606 = vmatmul.msk.f32.gmra.mxu3 %vm400_vm1, %v1594_v16  ;;  %v1360_v1 = vpop.f32.mrf.mxu0 }
 0x18c   : > { %2539 = vmatmul.msk.f32.gmra.mxu1 %vm400_vm1, %v3218_v31 }
 0x18d   : > { %v926_v29 = vpop.f32.mrf.mxu2 }
 0x18e   : > { %v988_v30 = vadd.f32 %v926_v29, %v805_v55  ;;  %v1206_v58 = vpop.f32.mrf.mxu3  ;;  %2640 = vmatmul.msk.f32.gmra.mxu0 %vm400_vm1, %v1596_v42 }
 0x190   : > { %v1268_v57 = vadd.f32 %v1206_v58, %v988_v30  ;;  %v1598_v58 = vld [vmem:[#allocation2 + $0x52] sm:$0xff] }
 0x191   : > { %v810_v9 = vpop.f32.mrf.mxu1 }
 0x192   : > { %v3632_v26 = vadd.f32 %v1360_v1, %v1268_v57  ;;  %2573 = vmatmul.msk.f32.gmra.mxu2 %vm400_vm1, %v1593_v27  ;;  %v811_v4 = vadd.f32 %v810_v9, %v3318_v25 }
 0x193   : > { %2607 = vmatmul.msk.f32.gmra.mxu3 %vm400_vm1, %v1595_v18  ;;  %v1363_v22 = vpop.f32.mrf.mxu0 }
 0x194   : > { %2540 = vmatmul.msk.f32.gmra.mxu1 %vm400_vm1, %v3227_v33 }
 0x195   : > { %v929_v31 = vpop.f32.mrf.mxu2 }
 0x196   : > { %v989_v34 = vadd.f32 %v929_v31, %v808_v50  ;;  %v1209_v55 = vpop.f32.mrf.mxu3  ;;  %2641 = vmatmul.msk.f32.gmra.mxu0 %vm400_vm1, %v1597_v52 }
 0x198   : > { %v1269_v29 = vadd.f32 %v1209_v55, %v989_v34  ;;  %v1599_v34 = vld [vmem:[#allocation2 + $0x62] sm:$0xff] }
 0x199   : > { %v813_v30 = vpop.f32.mrf.mxu1 }
 0x19a   : > { %v3640_v1 = vadd.f32 %v1363_v22, %v1269_v29  ;;  %2574 = vmatmul.msk.f32.gmra.mxu2 %vm400_vm1, %v1594_v16  ;;  %v814_v25 = vadd.f32 %v813_v30, %v3342_v7 }
 0x19b   : > { %2608 = vmatmul.msk.f32.gmra.mxu3 %vm400_vm1, %v1596_v42  ;;  %v1366_v27 = vpop.f32.mrf.mxu0 }
 0x19c   : > { %2541 = vmatmul.msk.f32.gmra.mxu1 %vm400_vm1, %v3237_v35 }
 0x19d   : > { %v932_v33 = vpop.f32.mrf.mxu2 }
 0x19e   : > { %v990_v47 = vadd.f32 %v932_v33, %v811_v4  ;;  %v1212_v57 = vpop.f32.mrf.mxu3  ;;  %2642 = vmatmul.msk.f32.gmra.mxu0 %vm400_vm1, %v1598_v58  ;;  %v1600_v33 = vld [vmem:[#allocation2 + $0x6a] sm:$0xff] }
 0x1a0   : > { %v1270_v50 = vadd.f32 %v1212_v57, %v990_v47 }
 0x1a1   : > { %v816_v31 = vpop.f32.mrf.mxu1 }
 0x1a2   : > { %v3648_v22 = vadd.f32 %v1366_v27, %v1270_v50  ;;  %2575 = vmatmul.msk.f32.gmra.mxu2 %vm400_vm1, %v1595_v18  ;;  %v817_v7 = vadd.f32 %v816_v31, %v3366_v23 }
 0x1a3   : > { %2609 = vmatmul.msk.f32.gmra.mxu3 %vm400_vm1, %v1597_v52  ;;  %v1369_v16 = vpop.f32.mrf.mxu0 }
 0x1a4   : > { %2542 = vmatmul.msk.f32.gmra.mxu1 %vm400_vm1, %v3248_v38 }
 0x1a5   : > { %v935_v35 = vpop.f32.mrf.mxu2 }
 0x1a6   : > { %v991_v9 = vadd.f32 %v935_v35, %v814_v25  ;;  %v1215_v55 = vpop.f32.mrf.mxu3  ;;  %2643 = vmatmul.msk.f32.gmra.mxu0 %vm400_vm1, %v1599_v34  ;;  %v1601_v25 = vld [vmem:[#allocation2 + $0x7a] sm:$0xff] }
 0x1a8   : > { %v1271_v29 = vadd.f32 %v1215_v55, %v991_v9 }
 0x1a9   : > { %v819_v4 = vpop.f32.mrf.mxu1 }
 0x1aa   : > { %v3656_v27 = vadd.f32 %v1369_v16, %v1271_v29  ;;  %2576 = vmatmul.msk.f32.gmra.mxu2 %vm400_vm1, %v1596_v42  ;;  %v820_v23 = vadd.f32 %v819_v4, %v3384_v59 }
 0x1ab   : > { %2610 = vmatmul.msk.f32.gmra.mxu3 %vm400_vm1, %v1598_v58  ;;  %v1372_v18 = vpop.f32.mrf.mxu0 }
 0x1ac   : > { %2543 = vmatmul.msk.f32.gmra.mxu1 %vm400_vm1, %v3261_v41 }
 0x1ad   : > { %v938_v38 = vpop.f32.mrf.mxu2 }
 0x1ae   : > { %v992_v30 = vadd.f32 %v938_v38, %v817_v7  ;;  %v1218_v47 = vpop.f32.mrf.mxu3  ;;  %2644 = vmatmul.msk.f32.gmra.mxu0 %vm400_vm1, %v1600_v33 }
 0x1b0   : > { %v1272_v57 = vadd.f32 %v1218_v47, %v992_v30 }
 0x1b1   : > { %v822_v50 = vpop.f32.mrf.mxu1 }
 0x1b2   : > { %v3664_v16 = vadd.f32 %v1372_v18, %v1272_v57  ;;  %2577 = vmatmul.msk.f32.gmra.mxu2 %vm400_vm1, %v1597_v52  ;;  %v1602_v18 = vld [vmem:[#allocation2 + $0x82] sm:$0xff]  ;;  %v823_v59 = vadd.f32 %v822_v50, %v3400_v2  ;;  %v1603_v57 = vld [vmem:[#allocation2 + $0x92] sm:$0xff] }
 0x1b3   : > { %2611 = vmatmul.msk.f32.gmra.mxu3 %vm400_vm1, %v1599_v34  ;;  %v1375_v42 = vpop.f32.mrf.mxu0  ;;  %v3984_v50 = vld [vmem:[#allocation8_spill] sm:$0xff] }
 0x1b4   : > { %2544 = vmatmul.msk.f32.gmra.mxu1 %vm400_vm1, %v3278_v48 }
 0x1b5   : > { %v941_v41 = vpop.f32.mrf.mxu2 }
 0x1b6   : > { %v993_v31 = vadd.f32 %v941_v41, %v820_v23  ;;  %v1221_v35 = vpop.f32.mrf.mxu3  ;;  %2645 = vmatmul.msk.f32.gmra.mxu0 %vm400_vm1, %v1601_v25 }
 0x1b8   : > { %v1273_v9 = vadd.f32 %v1221_v35, %v993_v31 }
 0x1b9   : > { %v825_v55 = vpop.f32.mrf.mxu1 }
 0x1ba   : > { %v3672_v29 = vadd.f32 %v1375_v42, %v1273_v9  ;;  %2578 = vmatmul.msk.f32.gmra.mxu2 %vm400_vm1, %v1598_v58  ;;  %v826_v2 = vadd.f32 %v825_v55, %v3266_v43  ;;  %v1604_v9 = vld [vmem:[#allocation2 + $0x9a] sm:$0xff]  ;;  %v3986_v55 = vld [vmem:[#allocation10_spill] sm:$0xff] }
 0x1bb   : > { %2612 = vmatmul.msk.f32.gmra.mxu3 %vm400_vm1, %v1600_v33  ;;  %v1378_v52 = vpop.f32.mrf.mxu0 }
 0x1bc   : > { %2545 = vmatmul.msk.f32.gmra.mxu1 %vm400_vm1, %v3296_v54 }
 0x1bd   : > { %v944_v48 = vpop.f32.mrf.mxu2 }
 0x1be   : > { %v994_v4 = vadd.f32 %v944_v48, %v823_v59  ;;  %v1224_v7 = vpop.f32.mrf.mxu3  ;;  %2646 = vmatmul.msk.f32.gmra.mxu0 %vm400_vm1, %v1602_v18 }
 0x1c0   : > { %v1274_v38 = vadd.f32 %v1224_v7, %v994_v4 }
 0x1c1   : > { %v828_v30 = vpop.f32.mrf.mxu1 }
 0x1c2   : > { %v3680_v47 = vadd.f32 %v1378_v52, %v1274_v38  ;;  %2579 = vmatmul.msk.f32.gmra.mxu2 %vm400_vm1, %v1599_v34  ;;  %v3985_v52 = vld [vmem:[#allocation6_spill] sm:$0xff] }
 0x1c3   : > { %2613 = vmatmul.msk.f32.gmra.mxu3 %vm400_vm1, %v1601_v25  ;;  %v1381_v58 = vpop.f32.mrf.mxu0  ;;  %v829_v43 = vadd.f32 %v828_v30, %v3985_v52 }
 0x1c4   : > { %2546 = vmatmul.msk.f32.gmra.mxu1 %vm400_vm1, %v3984_v50  ;;  %v3987_v50 = vld [vmem:[#allocation7_spill] sm:$0xff] }
 0x1c5   : > { %v947_v54 = vpop.f32.mrf.mxu2 }
 0x1c6   : > { %v995_v42 = vadd.f32 %v947_v54, %v826_v2  ;;  %v1227_v23 = vpop.f32.mrf.mxu3  ;;  %2647 = vmatmul.msk.f32.gmra.mxu0 %vm400_vm1, %v1603_v57  ;;  %v1605_v2 = vld [vmem:[#allocation2 + $0xaa] sm:$0xff]  ;;  %v3988_v54 = vld [vmem:[#allocation12_spill] sm:$0xff] }
 0x1c8   : > { %v1275_v41 = vadd.f32 %v1227_v23, %v995_v42 }
 0x1c9   : > { %v831_v31 = vpop.f32.mrf.mxu1 }
 0x1ca   : > { %v3688_v35 = vadd.f32 %v1381_v58, %v1275_v41  ;;  %2580 = vmatmul.msk.f32.gmra.mxu2 %vm400_vm1, %v1600_v33  ;;  %v832_v30 = vadd.f32 %v831_v31, %v3987_v50 }
 0x1cb   : > { %2614 = vmatmul.msk.f32.gmra.mxu3 %vm400_vm1, %v1602_v18  ;;  %v1384_v34 = vpop.f32.mrf.mxu0 }
 0x1cc   : > { %2547 = vmatmul.msk.f32.gmra.mxu1 %vm400_vm1, %v3986_v55  ;;  %v1606_v55 = vld [vmem:[#allocation2 + $0xb2] sm:$0xff] }
 0x1cd   : > { %v950_v59 = vpop.f32.mrf.mxu2 }
 0x1ce   : > { %v996_v48 = vadd.f32 %v950_v59, %v829_v43  ;;  %v1230_v4 = vpop.f32.mrf.mxu3  ;;  %2648 = vmatmul.msk.f32.gmra.mxu0 %vm400_vm1, %v1604_v9  ;;  %v3989_v59 = vld [vmem:[#allocation9_spill] sm:$0xff] }
 0x1d0   : > { %v1276_v7 = vadd.f32 %v1230_v4, %v996_v48 }
 0x1d1   : > { %v834_v38 = vpop.f32.mrf.mxu1 }
 0x1d2   : > { %v3696_v58 = vadd.f32 %v1384_v34, %v1276_v7  ;;  %2581 = vmatmul.msk.f32.gmra.mxu2 %vm400_vm1, %v1601_v25  ;;  %v835_v31 = vadd.f32 %v834_v38, %v3989_v59 }
 0x1d3   : > { %2615 = vmatmul.msk.f32.gmra.mxu3 %vm400_vm1, %v1603_v57  ;;  %v1387_v33 = vpop.f32.mrf.mxu0 }
 0x1d4   : > { %2548 = vmatmul.msk.f32.gmra.mxu1 %vm400_vm1, %v3988_v54  ;;  %v1607_v54 = vld [vmem:[#allocation2 + $0xc2] sm:$0xff] }
 0x1d5   : > { %v953_v42 = vpop.f32.mrf.mxu2 }
 0x1d6   : > { %v997_v23 = vadd.f32 %v953_v42, %v832_v30  ;;  %v1233_v41 = vpop.f32.mrf.mxu3  ;;  %2649 = vmatmul.msk.f32.gmra.mxu0 %vm400_vm1, %v1605_v2  ;;  %v3990_v42 = vld [vmem:[#allocation11_spill] sm:$0xff] }
 0x1d8   : > { %v1277_v52 = vadd.f32 %v1233_v41, %v997_v23 }
 0x1d9   : > { %v837_v43 = vpop.f32.mrf.mxu1 }
 0x1da   : > { %v3704_v34 = vadd.f32 %v1387_v33, %v1277_v52  ;;  %2582 = vmatmul.msk.f32.gmra.mxu2 %vm400_vm1, %v1602_v18  ;;  %v838_v38 = vadd.f32 %v837_v43, %v3990_v42 }
 0x1db   : > { %2616 = vmatmul.msk.f32.gmra.mxu3 %vm400_vm1, %v1604_v9  ;;  %v1390_v25 = vpop.f32.mrf.mxu0 }
 0x1dc   : > { %2549 = vmatmul.msk.f32.gmra.mxu1 %vm400_vm1, %v3380_v28 }
 0x1dd   : > { %v956_v48 = vpop.f32.mrf.mxu2 }
 0x1de   : > { %v998_v4 = vadd.f32 %v956_v48, %v835_v31  ;;  %v1236_v7 = vpop.f32.mrf.mxu3  ;;  %2650 = vmatmul.msk.f32.gmra.mxu0 %vm400_vm1, %v1606_v55  ;;  %v1608_v31 = vld [vmem:[#allocation2 + $0xca] sm:$0xff] }
 0x1df   : > { %v3991_v48 = vld [vmem:[#allocation13_spill] sm:$0xff] }
 0x1e0   : > { %v1278_v50 = vadd.f32 %v1236_v7, %v998_v4 }
 0x1e1   : > { %v840_v30 = vpop.f32.mrf.mxu1 }
 0x1e2   : > { %v3712_v33 = vadd.f32 %v1390_v25, %v1278_v50  ;;  %2583 = vmatmul.msk.f32.gmra.mxu2 %vm400_vm1, %v1603_v57  ;;  %v841_v43 = vadd.f32 %v840_v30, %v3991_v48 }
 0x1e3   : > { %2617 = vmatmul.msk.f32.gmra.mxu3 %vm400_vm1, %v1605_v2  ;;  %v1393_v18 = vpop.f32.mrf.mxu0 }
 0x1e4   : > { %2550 = vmatmul.msk.f32.gmra.mxu1 %vm400_vm1, %v3396_v21 }
 0x1e5   : > { %v959_v28 = vpop.f32.mrf.mxu2 }
 0x1e6   : > { %v999_v23 = vadd.f32 %v959_v28, %v838_v38  ;;  %v1239_v41 = vpop.f32.mrf.mxu3  ;;  %2651 = vmatmul.msk.f32.gmra.mxu0 %vm400_vm1, %v1607_v54  ;;  %v1609_v38 = vld [vmem:[#allocation2 + $0xda] sm:$0xff]  ;;  %v3992_v28 = vld [vmem:[#allocation14_spill] sm:$0xff] }
 0x1e8   : > { %v1279_v52 = vadd.f32 %v1239_v41, %v999_v23 }
 0x1e9   : > { %v843_v59 = vpop.f32.mrf.mxu1 }
 0x1ea   : > { %v3720_v25 = vadd.f32 %v1393_v18, %v1279_v52  ;;  %2584 = vmatmul.msk.f32.gmra.mxu2 %vm400_vm1, %v1604_v9  ;;  %v844_v30 = vadd.f32 %v843_v59, %v3992_v28  ;;  %v3993_v59 = vld [vmem:[#allocation15_spill] sm:$0xff] }
 0x1eb   : > { %2618 = vmatmul.msk.f32.gmra.mxu3 %vm400_vm1, %v1606_v55  ;;  %v1396_v57 = vpop.f32.mrf.mxu0 }
 0x1ec   : > { %2551 = vmatmul.msk.f32.gmra.mxu1 %vm400_vm1, %v3410_v63 }
 0x1ed   : > { %v962_v21 = vpop.f32.mrf.mxu2 }
 0x1ee   : > { %v1000_v4 = vadd.f32 %v962_v21, %v841_v43  ;;  %v1242_v7 = vpop.f32.mrf.mxu3  ;;  %2652 = vmatmul.msk.f32.gmra.mxu0 %vm400_vm1, %v1608_v31  ;;  %v1610_v43 = vld [vmem:[#allocation2 + $0xe2] sm:$0xff] }
 0x1f0   : > { %v1280_v50 = vadd.f32 %v1242_v7, %v1000_v4 }
 0x1f1   : > { %v846_v42 = vpop.f32.mrf.mxu1 }
 0x1f2   : > { %v3728_v18 = vadd.f32 %v1396_v57, %v1280_v50  ;;  %2585 = vmatmul.msk.f32.gmra.mxu2 %vm400_vm1, %v1605_v2  ;;  %v847_v21 = vadd.f32 %v846_v42, %v3993_v59  ;;  %v1611_v42 = vld [vmem:[#allocation2 + $0xf2] sm:$0xff] }
 0x1f3   : > { %2619 = vmatmul.msk.f32.gmra.mxu3 %vm400_vm1, %v1607_v54  ;;  %v1399_v9 = vpop.f32.mrf.mxu0 }
 0x1f4   : > { %2552 = vmatmul.msk.f32.gmra.mxu1 %vm400_vm1, %v3423_v6 }
 0x1f5   : > { %v965_v63 = vpop.f32.mrf.mxu2 }
 0x1f6   : > { %v1001_v23 = vadd.f32 %v965_v63, %v844_v30  ;;  %v1245_v41 = vpop.f32.mrf.mxu3  ;;  %2653 = vmatmul.msk.f32.gmra.mxu0 %vm400_vm1, %v1609_v38 }
 0x1f8   : > { %v1281_v52 = vadd.f32 %v1245_v41, %v1001_v23 }
 0x1f9   : > { %v1463_v48 = vpop.f32.mrf.mxu1 }
 0x1fa   : > { %v3736_v57 = vadd.f32 %v1399_v9, %v1281_v52  ;;  %2586 = vmatmul.msk.f32.gmra.mxu2 %vm400_vm1, %v1606_v55  ;;  %v1559_v30 = vadd.f32 %v1463_v48, %v3417_v61  ;;  %v1612_v61 = vld [vmem:[#allocation2 + $0xfa] sm:$0xff] }
 0x1fb   : > { %2620 = vmatmul.msk.f32.gmra.mxu3 %vm400_vm1, %v1608_v31  ;;  %v1402_v2 = vpop.f32.mrf.mxu0 }
 0x1fc   : > { %2553 = vmatmul.msk.f32.gmra.mxu1 %vm400_vm1, %v3436_v24 }
 0x1fd   : > { %v968_v6 = vpop.f32.mrf.mxu2 }
 0x1fe   : > { %v1002_v4 = vadd.f32 %v968_v6, %v847_v21  ;;  %v1248_v7 = vpop.f32.mrf.mxu3  ;;  %2654 = vmatmul.msk.f32.gmra.mxu0 %vm400_vm1, %v1610_v43 }
 0x200   : > { %v1282_v50 = vadd.f32 %v1248_v7, %v1002_v4  ;;  %v1613_v7 = vld [vmem:[#allocation2 + $0x10a] sm:$0xff] }
 0x201   : > { %v1466_v9 = vpop.f32.mrf.mxu1 }
 0x202   : > { %v3744_v28 = vadd.f32 %v1402_v2, %v1282_v50  ;;  %2587 = vmatmul.msk.f32.gmra.mxu2 %vm400_vm1, %v1607_v54  ;;  %v1560_v48 = vadd.f32 %v1466_v9, %v3430_v3 }
 0x203   : > { %2621 = vmatmul.msk.f32.gmra.mxu3 %vm400_vm1, %v1609_v38  ;;  %v2051_v55 = vpop.f32.mrf.mxu0 }
 0x204   : > { %2554 = vmatmul.msk.f32.gmra.mxu1 %vm400_vm1, %v3449_v53 }
 0x205   : > { %v1743_v24 = vpop.f32.mrf.mxu2 }
 0x206   : > { %v1839_v63 = vadd.f32 %v1743_v24, %v1559_v30  ;;  %v1897_v23 = vpop.f32.mrf.mxu3  ;;  %2655 = vmatmul.msk.f32.gmra.mxu0 %vm400_vm1, %v1611_v42 }
 0x208   : > { %v1993_v41 = vadd.f32 %v1897_v23, %v1839_v63  ;;  %v1614_v23 = vld [vmem:[#allocation2 + $0x112] sm:$0xff] }
 0x209   : > { %v1469_v54 = vpop.f32.mrf.mxu1 }
 0x20a   : > { %v2147_v52 = vadd.f32 %v2051_v55, %v1993_v41  ;;  %2588 = vmatmul.msk.f32.gmra.mxu2 %vm400_vm1, %v1608_v31  ;;  %v1561_v50 = vadd.f32 %v1469_v54, %v3443_v5 }
 0x20b   : > { %2622 = vmatmul.msk.f32.gmra.mxu3 %vm400_vm1, %v1610_v43  ;;  %v2054_v2 = vpop.f32.mrf.mxu0 }
 0x20c   : > { %2180 = vst.msk [vmem:[%s3758_s6] sm:$0xff] %vm2179_vm2, %v2147_v52  ;;  %2555 = vmatmul.msk.f32.gmra.mxu1 %vm400_vm1, %v3462_v11 }
 0x20d   : > { %v1746_v53 = vpop.f32.mrf.mxu2 }
 0x20e   : > { %v1840_v59 = vadd.f32 %v1746_v53, %v1560_v48  ;;  %v1900_v21 = vpop.f32.mrf.mxu3  ;;  %2656 = vmatmul.msk.f32.gmra.mxu0 %vm400_vm1, %v1612_v61  ;;  %v1615_v53 = vld [vmem:[#allocation2 + $0x122] sm:$0xff] }
 0x210   : > { %v1994_v31 = vadd.f32 %v1900_v21, %v1840_v59 }
 0x211   : > { %v1472_v6 = vpop.f32.mrf.mxu1 }
 0x212   : > { %v2148_v4 = vadd.f32 %v2054_v2, %v1994_v31  ;;  %2589 = vmatmul.msk.f32.gmra.mxu2 %vm400_vm1, %v1609_v38  ;;  %v1562_v5 = vadd.f32 %v1472_v6, %v3456_v40 }
 0x213   : > { %2623 = vmatmul.msk.f32.gmra.mxu3 %vm400_vm1, %v1611_v42  ;;  %v2057_v3 = vpop.f32.mrf.mxu0 }
 0x214   : > { %2181 = vst.msk [vmem:[%s3758_s6 + $0x8] sm:$0xff] %vm2179_vm2, %v2148_v4  ;;  %2556 = vmatmul.msk.f32.gmra.mxu1 %vm400_vm1, %v3475_v56 }
 0x215   : > { %v1749_v11 = vpop.f32.mrf.mxu2 }
 0x216   : > { %v1841_v9 = vadd.f32 %v1749_v11, %v1561_v50  ;;  %v1903_v55 = vpop.f32.mrf.mxu3  ;;  %2657 = vmatmul.msk.f32.gmra.mxu0 %vm400_vm1, %v1613_v7 }
 0x218   : > { %v1995_v30 = vadd.f32 %v1903_v55, %v1841_v9 }
 0x219   : > { %v1475_v24 = vpop.f32.mrf.mxu1 }
 0x21a   : > { %v2149_v38 = vadd.f32 %v2057_v3, %v1995_v30  ;;  %2590 = vmatmul.msk.f32.gmra.mxu2 %vm400_vm1, %v1610_v43  ;;  %v1563_v40 = vadd.f32 %v1475_v24, %v3469_v46  ;;  %v1616_v3 = vld [vmem:[#allocation2 + $0x12a] sm:$0xff]  ;;  %v1617_v24 = vld [vmem:[#allocation2 + $0x13a] sm:$0xff] }
 0x21b   : > { %2624 = vmatmul.msk.f32.gmra.mxu3 %vm400_vm1, %v1612_v61  ;;  %v2060_v63 = vpop.f32.mrf.mxu0 }
 0x21c   : > { %2182 = vst.msk [vmem:[%s3758_s6 + $0x10] sm:$0xff] %vm2179_vm2, %v2149_v38  ;;  %2557 = vmatmul.msk.f32.gmra.mxu1 %vm400_vm1, %v3488_v10 }
 0x21d   : > { %v1752_v56 = vpop.f32.mrf.mxu2 }
 0x21e   : > { %v1842_v41 = vadd.f32 %v1752_v56, %v1562_v5  ;;  %v1906_v54 = vpop.f32.mrf.mxu3  ;;  %2658 = vmatmul.msk.f32.gmra.mxu0 %vm400_vm1, %v1614_v23 }
 0x220   : > { %v1996_v52 = vadd.f32 %v1906_v54, %v1842_v41 }
 0x221   : > { %v1478_v2 = vpop.f32.mrf.mxu1 }
 0x222   : > { %v2150_v43 = vadd.f32 %v2060_v63, %v1996_v52  ;;  %2591 = vmatmul.msk.f32.gmra.mxu2 %vm400_vm1, %v1611_v42  ;;  %v1564_v46 = vadd.f32 %v1478_v2, %v3482_v51  ;;  %v3994_v51 = vld [vmem:[#allocation16_spill] sm:$0xff]  ;;  %v3995_v2 = vld [vmem:[#allocation17_spill] sm:$0xff] }
 0x223   : > { %2625 = vmatmul.msk.f32.gmra.mxu3 %vm400_vm1, %v1613_v7  ;;  %v2063_v48 = vpop.f32.mrf.mxu0  ;;  %v1618_v52 = vld [vmem:[#allocation2 + $0x142] sm:$0xff] }
 0x224   : > { %2183 = vst.msk [vmem:[%s3758_s6 + $0x18] sm:$0xff] %vm2179_vm2, %v2150_v43  ;;  %2558 = vmatmul.msk.f32.gmra.mxu1 %vm400_vm1, %v3501_v20 }
 0x225   : > { %v1755_v10 = vpop.f32.mrf.mxu2 }
 0x226   : > { %v1843_v59 = vadd.f32 %v1755_v10, %v1563_v40  ;;  %v1909_v21 = vpop.f32.mrf.mxu3  ;;  %2659 = vmatmul.msk.f32.gmra.mxu0 %vm400_vm1, %v1615_v53 }
 0x228   : > { %v1997_v31 = vadd.f32 %v1909_v21, %v1843_v59 }
 0x229   : > { %v1481_v6 = vpop.f32.mrf.mxu1 }
 0x22a   : > { %v2151_v42 = vadd.f32 %v2063_v48, %v1997_v31  ;;  %2592 = vmatmul.msk.f32.gmra.mxu2 %vm400_vm1, %v1612_v61  ;;  %v1565_v38 = vadd.f32 %v1481_v6, %v3994_v51  ;;  %v1619_v31 = vld [vmem:[#allocation2 + $0x152] sm:$0xff] }
 0x22b   : > { %2626 = vmatmul.msk.f32.gmra.mxu3 %vm400_vm1, %v1614_v23  ;;  %v2066_v4 = vpop.f32.mrf.mxu0 }
 0x22c   : > { %2184 = vst.msk [vmem:[%s3758_s6 + $0x20] sm:$0xff] %vm2179_vm2, %v2151_v42  ;;  %2559 = vmatmul.msk.f32.gmra.mxu1 %vm400_vm1, %v3515_v15 }
 0x22d   : > { %v1758_v20 = vpop.f32.mrf.mxu2 }
 0x22e   : > { %v1844_v50 = vadd.f32 %v1758_v20, %v1564_v46  ;;  %v1912_v11 = vpop.f32.mrf.mxu3  ;;  %2660 = vmatmul.msk.f32.gmra.mxu0 %vm400_vm1, %v1616_v3 }
 0x230   : > { %v1998_v9 = vadd.f32 %v1912_v11, %v1844_v50  ;;  %v1620_v11 = vld [vmem:[#allocation2 + $0x15a] sm:$0xff] }
 0x231   : > { %v1484_v55 = vpop.f32.mrf.mxu1 }
 0x232   : > { %v2152_v61 = vadd.f32 %v2066_v4, %v1998_v9  ;;  %2593 = vmatmul.msk.f32.gmra.mxu2 %vm400_vm1, %v1613_v7  ;;  %v1566_v43 = vadd.f32 %v1484_v55, %v3995_v2 }
 0x233   : > { %2627 = vmatmul.msk.f32.gmra.mxu3 %vm400_vm1, %v1615_v53  ;;  %v2069_v30 = vpop.f32.mrf.mxu0 }
 0x234   : > { %2185 = vst.msk [vmem:[%s3758_s6 + $0x28] sm:$0xff] %vm2179_vm2, %v2152_v61  ;;  %2560 = vmatmul.msk.f32.gmra.mxu1 %vm400_vm1, %v3532_v37 }
 0x235   : > { %v1761_v15 = vpop.f32.mrf.mxu2 }
 0x236   : > { %v1845_v63 = vadd.f32 %v1761_v15, %v1565_v38  ;;  %v1915_v5 = vpop.f32.mrf.mxu3  ;;  %2661 = vmatmul.msk.f32.gmra.mxu0 %vm400_vm1, %v1617_v24  ;;  %v1621_v38 = vld [vmem:[#allocation2 + $0x16a] sm:$0xff] }
 0x238   : > { %v1999_v56 = vadd.f32 %v1915_v5, %v1845_v63 }
 0x239   : > { %v1487_v41 = vpop.f32.mrf.mxu1 }
 0x23a   : > { %v2153_v7 = vadd.f32 %v2069_v30, %v1999_v56  ;;  %2594 = vmatmul.msk.f32.gmra.mxu2 %vm400_vm1, %v1614_v23  ;;  %v1567_v6 = vadd.f32 %v1487_v41, %v3525_v60 }
 0x23b   : > { %2628 = vmatmul.msk.f32.gmra.mxu3 %vm400_vm1, %v1616_v3  ;;  %v2072_v54 = vpop.f32.mrf.mxu0 }
 0x23c   : > { %2186 = vst.msk [vmem:[%s3758_s6 + $0x30] sm:$0xff] %vm2179_vm2, %v2153_v7  ;;  %2561 = vmatmul.msk.f32.gmra.mxu1 %vm400_vm1, %v3546_v39  ;;  %v1622_v7 = vld [vmem:[#allocation2 + $0x172] sm:$0xff] }
 0x23d   : > { %v1764_v37 = vpop.f32.mrf.mxu2 }
 0x23e   : > { %v1846_v48 = vadd.f32 %v1764_v37, %v1566_v43  ;;  %v1918_v40 = vpop.f32.mrf.mxu3  ;;  %2662 = vmatmul.msk.f32.gmra.mxu0 %vm400_vm1, %v1618_v52 }
 0x240   : > { %v2000_v10 = vadd.f32 %v1918_v40, %v1846_v48  ;;  %v1623_v40 = vld [vmem:[#allocation2 + $0x182] sm:$0xff] }
 0x241   : > { %v1490_v59 = vpop.f32.mrf.mxu1 }
 0x242   : > { %v2154_v23 = vadd.f32 %v2072_v54, %v2000_v10  ;;  %2595 = vmatmul.msk.f32.gmra.mxu2 %vm400_vm1, %v1615_v53  ;;  %v1568_v60 = vadd.f32 %v1490_v59, %v3539_v49 }
 0x243   : > { %2629 = vmatmul.msk.f32.gmra.mxu3 %vm400_vm1, %v1617_v24  ;;  %v2075_v21 = vpop.f32.mrf.mxu0 }
 0x244   : > { %2187 = vst.msk [vmem:[%s3758_s6 + $0x38] sm:$0xff] %vm2179_vm2, %v2154_v23  ;;  %2562 = vmatmul.msk.f32.gmra.mxu1 %vm400_vm1, %v3559_v36 }
 0x245   : > { %v1767_v39 = vpop.f32.mrf.mxu2 }
 0x246   : > { %v1847_v42 = vadd.f32 %v1767_v39, %v1567_v6  ;;  %v1921_v4 = vpop.f32.mrf.mxu3  ;;  %2663 = vmatmul.msk.f32.gmra.mxu0 %vm400_vm1, %v1619_v31  ;;  %v1624_v39 = vld [vmem:[#allocation2 + $0x18a] sm:$0xff] }
 0x248   : > { %v2001_v46 = vadd.f32 %v1921_v4, %v1847_v42 }
 0x249   : > { %v1493_v20 = vpop.f32.mrf.mxu1 }
 0x24a   : > { %v2155_v53 = vadd.f32 %v2075_v21, %v2001_v46  ;;  %2596 = vmatmul.msk.f32.gmra.mxu2 %vm400_vm1, %v1616_v3  ;;  %v1569_v49 = vadd.f32 %v1493_v20, %v3553_v8 }
 0x24b   : > { %2630 = vmatmul.msk.f32.gmra.mxu3 %vm400_vm1, %v1618_v52  ;;  %v2078_v50 = vpop.f32.mrf.mxu0 }
 0x24c   : > { %2188 = vst.msk [vmem:[%s3758_s6 + $0x40] sm:$0xff] %vm2179_vm2, %v2155_v53  ;;  %2563 = vmatmul.msk.f32.gmra.mxu1 %vm400_vm1, %v3572_v45 }
 0x24d   : > { %v1770_v36 = vpop.f32.mrf.mxu2 }
 0x24e   : > { %v1848_v9 = vadd.f32 %v1770_v36, %v1568_v60  ;;  %v1924_v55 = vpop.f32.mrf.mxu3  ;;  %2664 = vmatmul.msk.f32.gmra.mxu0 %vm400_vm1, %v1620_v11 }
 0x250   : > { %v2002_v61 = vadd.f32 %v1924_v55, %v1848_v9 }
 0x251   : > { %v1496_v30 = vpop.f32.mrf.mxu1 }
 0x252   : > { %v2156_v3 = vadd.f32 %v2078_v50, %v2002_v61  ;;  %2597 = vmatmul.msk.f32.gmra.mxu2 %vm400_vm1, %v1617_v24  ;;  %v1570_v8 = vadd.f32 %v1496_v30, %v3566_v13  ;;  %v1038_v50 = vld [vmem:[#allocation2 + $0x1a1] sm:$0xff] }
 0x253   : > { %2631 = vmatmul.msk.f32.gmra.mxu3 %vm400_vm1, %v1619_v31  ;;  %v2081_v51 = vpop.f32.mrf.mxu0 }
 0x254   : > { %2189 = vst.msk [vmem:[%s3758_s6 + $0x48] sm:$0xff] %vm2179_vm2, %v2156_v3  ;;  %2564 = vmatmul.msk.f32.gmra.mxu1 %vm400_vm1, %v3585_v12 }
 0x255   : > { %v1773_v45 = vpop.f32.mrf.mxu2 }
 0x256   : > { %v1849_v15 = vadd.f32 %v1773_v45, %v1569_v49  ;;  %v1927_v63 = vpop.f32.mrf.mxu3  ;;  %2665 = vmatmul.msk.f32.gmra.mxu0 %vm400_vm1, %v1621_v38  ;;  %v1626_v49 = vld [vmem:[#allocation2 + $0x1a2] sm:$0xff] }
 0x258   : > { %v2003_v5 = vadd.f32 %v1927_v63, %v1849_v15 }
 0x259   : > { %v1499_v56 = vpop.f32.mrf.mxu1 }
 0x25a   : > { %v2157_v24 = vadd.f32 %v2081_v51, %v2003_v5  ;;  %2598 = vmatmul.msk.f32.gmra.mxu2 %vm400_vm1, %v1618_v52  ;;  %v1571_v13 = vadd.f32 %v1499_v56, %v3579_v14 }
 0x25b   : > { %2632 = vmatmul.msk.f32.gmra.mxu3 %vm400_vm1, %v1620_v11  ;;  %v2084_v41 = vpop.f32.mrf.mxu0 }
 0x25c   : > { %2190 = vst.msk [vmem:[%s3758_s6 + $0x50] sm:$0xff] %vm2179_vm2, %v2157_v24  ;;  %2565 = vmatmul.msk.f32.gmra.mxu1 %vm400_vm1, %v3597_v19 }
 0x25d   : > { %v1776_v12 = vpop.f32.mrf.mxu2 }
 0x25e   : > { %v1850_v54 = vadd.f32 %v1776_v12, %v1570_v8  ;;  %v1930_v2 = vpop.f32.mrf.mxu3  ;;  %2666 = vmatmul.msk.f32.gmra.mxu0 %vm400_vm1, %v1622_v7 }
 0x260   : > { %v2004_v43 = vadd.f32 %v1930_v2, %v1850_v54 }
 0x261   : > { %v1502_v37 = vpop.f32.mrf.mxu1 }
 0x262   : > { %v2158_v52 = vadd.f32 %v2084_v41, %v2004_v43  ;;  %2599 = vmatmul.msk.f32.gmra.mxu2 %vm400_vm1, %v1619_v31  ;;  %v1037_v31 = vld [vmem:[#allocation2 + $0x199] sm:$0xff]  ;;  %v1572_v42 = vadd.f32 %v1502_v37, %v3592_v17 }
 0x263   : > { %2633 = vmatmul.msk.f32.gmra.mxu3 %vm400_vm1, %v1621_v38  ;;  %v2087_v48 = vpop.f32.mrf.mxu0  ;;  %v1625_v17 = vld [vmem:[#allocation2 + $0x19a] sm:$0xff] }
 0x264   : > { %2191 = vst.msk [vmem:[%s3758_s6 + $0x58] sm:$0xff] %vm2179_vm2, %v2158_v52  ;;  %2566 = vmatmul.msk.f32.gmra.mxu1 %vm400_vm1, %v3609_v62 }
 0x265   : > { %v1779_v19 = vpop.f32.mrf.mxu2 }
 0x266   : > { %v1851_v10 = vadd.f32 %v1779_v19, %v1571_v13  ;;  %v1933_v59 = vpop.f32.mrf.mxu3  ;;  %2667 = vmatmul.msk.f32.gmra.mxu0 %vm400_vm1, %v1623_v40 }
 0x268   : > { %v2005_v23 = vadd.f32 %v1933_v59, %v1851_v10 }
 0x269   : > { %v1505_v21 = vpop.f32.mrf.mxu1 }
 0x26a   : > { %v2159_v6 = vadd.f32 %v2087_v48, %v2005_v23  ;;  %2600 = vmatmul.msk.f32.gmra.mxu2 %vm400_vm1, %v1620_v11  ;;  %v1573_v36 = vadd.f32 %v1505_v21, %v3604_v32 }
 0x26b   : > { %2634 = vmatmul.msk.f32.gmra.mxu3 %vm400_vm1, %v1622_v7  ;;  %v2090_v14 = vpop.f32.mrf.mxu0 }
 0x26c   : > { %2192 = vst.msk [vmem:[%s3758_s6 + $0x60] sm:$0xff] %vm2179_vm2, %v2159_v6  ;;  %2567 = vmatmul.msk.f32.gmra.mxu1 %vm400_vm1, %v1037_v31 }
 0x26d   : > { %v1782_v62 = vpop.f32.mrf.mxu2 }
 0x26e   : > { %v1852_v4 = vadd.f32 %v1782_v62, %v1572_v42  ;;  %v1936_v46 = vpop.f32.mrf.mxu3  ;;  %2668 = vmatmul.msk.f32.gmra.mxu0 %vm400_vm1, %v1624_v39 }
 0x270   : > { %v2006_v20 = vadd.f32 %v1936_v46, %v1852_v4 }
 0x271   : > { %v1508_v53 = vpop.f32.mrf.mxu1 }
 0x272   : > { %v2160_v11 = vadd.f32 %v2090_v14, %v2006_v20  ;;  %2601 = vmatmul.msk.f32.gmra.mxu2 %vm400_vm1, %v1621_v38  ;;  %v1574_v32 = vadd.f32 %v1508_v53, %v3616_v44 }
 0x273   : > { %2635 = vmatmul.msk.f32.gmra.mxu3 %vm400_vm1, %v1623_v40  ;;  %v2093_v60 = vpop.f32.mrf.mxu0 }
 0x274   : > { %2193 = vst.msk [vmem:[%s3758_s6 + $0x68] sm:$0xff] %vm2179_vm2, %v2160_v11  ;;  %2568 = vmatmul.msk.f32.gmra.mxu1 %vm400_vm1, %v1038_v50 }
 0x275   : > { %v1785_v9 = vpop.f32.mrf.mxu2 }
 0x276   : > { %v1853_v55 = vadd.f32 %v1785_v9, %v1573_v36  ;;  %v1939_v61 = vpop.f32.mrf.mxu3  ;;  %2669 = vmatmul.msk.f32.gmra.mxu0 %vm400_vm1, %v1625_v17 }
 0x278   : > { %v2007_v30 = vadd.f32 %v1939_v61, %v1853_v55 }
 0x279   : > { %v1511_v3 = vpop.f32.mrf.mxu1 }
 0x27a   : > { %v2161_v51 = vadd.f32 %v2093_v60, %v2007_v30  ;;  %2602 = vmatmul.msk.f32.gmra.mxu2 %vm400_vm1, %v1622_v7  ;;  %v1575_v7 = vadd.f32 %v1511_v3, %v3624_v0 }
 0x27b   : > { %2636 = vmatmul.msk.f32.gmra.mxu3 %vm400_vm1, %v1624_v39  ;;  %v2096_v38 = vpop.f32.mrf.mxu0 }
 0x27c   : > { %2194 = vst.msk [vmem:[%s3758_s6 + $0x70] sm:$0xff] %vm2179_vm2, %v2161_v51 }
 0x27d   : > { %v1788_v45 = vpop.f32.mrf.mxu2 }
 0x27e   : > { %v1854_v15 = vadd.f32 %v1788_v45, %v1574_v32  ;;  %v1942_v63 = vpop.f32.mrf.mxu3  ;;  %2670 = vmatmul.msk.f32.gmra.mxu0 %vm400_vm1, %v1626_v49 }
 0x280   : > { %v2008_v5 = vadd.f32 %v1942_v63, %v1854_v15 }
 0x281   : > { %v1514_v56 = vpop.f32.mrf.mxu1 }
 0x282   : > { %v2162_v24 = vadd.f32 %v2096_v38, %v2008_v5  ;;  %v1576_v52 = vadd.f32 %v1514_v56, %v3632_v26 }
 0x283   : > { %v2099_v41 = vpop.f32.mrf.mxu0 }
 0x284   : > { %2195 = vst.msk [vmem:[%s3758_s6 + $0x78] sm:$0xff] %vm2179_vm2, %v2162_v24 }
 0x285   : > { %v1791_v8 = vpop.f32.mrf.mxu2 }
 0x286   : > { %v1855_v12 = vadd.f32 %v1791_v8, %v1575_v7  ;;  %v1945_v44 = vpop.f32.mrf.mxu3 }
 0x288   : > { %v2009_v54 = vadd.f32 %v1945_v44, %v1855_v12 }
 0x289   : > { %v1517_v2 = vpop.f32.mrf.mxu1 }
 0x28a   : > { %v2163_v43 = vadd.f32 %v2099_v41, %v2009_v54  ;;  %v1577_v23 = vadd.f32 %v1517_v2, %v3640_v1 }
 0x28b   : > { %v2102_v37 = vpop.f32.mrf.mxu0 }
 0x28c   : > { %2196 = vst.msk [vmem:[%s3758_s6 + $0x80] sm:$0xff] %vm2179_vm2, %v2163_v43 }
 0x28d   : > { %v1794_v48 = vpop.f32.mrf.mxu2 }
 0x28e   : > { %v1856_v40 = vadd.f32 %v1794_v48, %v1576_v52  ;;  %v1948_v13 = vpop.f32.mrf.mxu3 }
 0x290   : > { %v2010_v19 = vadd.f32 %v1948_v13, %v1856_v40 }
 0x291   : > { %v1520_v0 = vpop.f32.mrf.mxu1 }
 0x292   : > { %v2164_v10 = vadd.f32 %v2102_v37, %v2010_v19  ;;  %v1578_v62 = vadd.f32 %v1520_v0, %v3648_v22 }
 0x293   : > { %v2105_v59 = vpop.f32.mrf.mxu0 }
 0x294   : > { %2197 = vst.msk [vmem:[%s3758_s6 + $0x88] sm:$0xff] %vm2179_vm2, %v2164_v10 }
 0x295   : > { %v1797_v21 = vpop.f32.mrf.mxu2 }
 0x296   : > { %v1857_v31 = vadd.f32 %v1797_v21, %v1577_v23  ;;  %v1951_v6 = vpop.f32.mrf.mxu3 }
 0x298   : > { %v2011_v14 = vadd.f32 %v1951_v6, %v1857_v31 }
 0x299   : > { %v1523_v26 = vpop.f32.mrf.mxu1 }
 0x29a   : > { %v2165_v39 = vadd.f32 %v2105_v59, %v2011_v14  ;;  %v1579_v60 = vadd.f32 %v1523_v26, %v3656_v27 }
 0x29b   : > { %v2108_v42 = vpop.f32.mrf.mxu0 }
 0x29c   : > { %2198 = vst.msk [vmem:[%s3758_s6 + $0x90] sm:$0xff] %vm2179_vm2, %v2165_v39 }
 0x29d   : > { %v1800_v4 = vpop.f32.mrf.mxu2 }
 0x29e   : > { %v1858_v46 = vadd.f32 %v1800_v4, %v1578_v62  ;;  %v1954_v20 = vpop.f32.mrf.mxu3 }
 0x2a0   : > { %v2012_v53 = vadd.f32 %v1954_v20, %v1858_v46 }
 0x2a1   : > { %v1526_v1 = vpop.f32.mrf.mxu1 }
 0x2a2   : > { %v2166_v50 = vadd.f32 %v2108_v42, %v2012_v53  ;;  %v1580_v3 = vadd.f32 %v1526_v1, %v3664_v16 }
 0x2a3   : > { %v2111_v11 = vpop.f32.mrf.mxu0 }
 0x2a4   : > { %2199 = vst.msk [vmem:[%s3758_s6 + $0x98] sm:$0xff] %vm2179_vm2, %v2166_v50 }
 0x2a5   : > { %v1803_v17 = vpop.f32.mrf.mxu2 }
 0x2a6   : > { %v1859_v36 = vadd.f32 %v1803_v17, %v1579_v60  ;;  %v1957_v9 = vpop.f32.mrf.mxu3 }
 0x2a8   : > { %v2013_v55 = vadd.f32 %v1957_v9, %v1859_v36 }
 0x2a9   : > { %v1529_v22 = vpop.f32.mrf.mxu1 }
 0x2aa   : > { %v2167_v61 = vadd.f32 %v2111_v11, %v2013_v55  ;;  %v1581_v63 = vadd.f32 %v1529_v22, %v3672_v29 }
 0x2ab   : > { %v2114_v30 = vpop.f32.mrf.mxu0 }
 0x2ac   : > { %2200 = vst.msk [vmem:[%s3758_s6 + $0xa0] sm:$0xff] %vm2179_vm2, %v2167_v61 }
 0x2ad   : > { %v1806_v51 = vpop.f32.mrf.mxu2 }
 0x2ae   : > { %v1860_v38 = vadd.f32 %v1806_v51, %v1580_v3  ;;  %v1960_v49 = vpop.f32.mrf.mxu3 }
 0x2b0   : > { %v2014_v32 = vadd.f32 %v1960_v49, %v1860_v38 }
 0x2b1   : > { %v1532_v27 = vpop.f32.mrf.mxu1 }
 0x2b2   : > { %v2168_v45 = vadd.f32 %v2114_v30, %v2014_v32  ;;  %v1582_v12 = vadd.f32 %v1532_v27, %v3680_v47 }
 0x2b3   : > { %v2117_v15 = vpop.f32.mrf.mxu0 }
 0x2b4   : > { %2201 = vst.msk [vmem:[%s3758_s6 + $0xa8] sm:$0xff] %vm2179_vm2, %v2168_v45 }
 0x2b5   : > { %v1809_v5 = vpop.f32.mrf.mxu2 }
 0x2b6   : > { %v1861_v56 = vadd.f32 %v1809_v5, %v1581_v63  ;;  %v1963_v24 = vpop.f32.mrf.mxu3 }
 0x2b8   : > { %v2015_v41 = vadd.f32 %v1963_v24, %v1861_v56 }
 0x2b9   : > { %v1535_v16 = vpop.f32.mrf.mxu1 }
 0x2ba   : > { %v2169_v7 = vadd.f32 %v2117_v15, %v2015_v41  ;;  %v1583_v48 = vadd.f32 %v1535_v16, %v3688_v35 }
 0x2bb   : > { %v2120_v8 = vpop.f32.mrf.mxu0 }
 0x2bc   : > { %2202 = vst.msk [vmem:[%s3758_s6 + $0xb0] sm:$0xff] %vm2179_vm2, %v2169_v7 }
 0x2bd   : > { %v1812_v44 = vpop.f32.mrf.mxu2 }
 0x2be   : > { %v1862_v54 = vadd.f32 %v1812_v44, %v1582_v12  ;;  %v1966_v2 = vpop.f32.mrf.mxu3 }
 0x2c0   : > { %v2016_v43 = vadd.f32 %v1966_v2, %v1862_v54 }
 0x2c1   : > { %v1538_v29 = vpop.f32.mrf.mxu1 }
 0x2c2   : > { %v2170_v37 = vadd.f32 %v2120_v8, %v2016_v43  ;;  %v1584_v23 = vadd.f32 %v1538_v29, %v3696_v58 }
 0x2c3   : > { %v2123_v52 = vpop.f32.mrf.mxu0 }
 0x2c4   : > { %2203 = vst.msk [vmem:[%s3758_s6 + $0xb8] sm:$0xff] %vm2179_vm2, %v2170_v37 }
 0x2c5   : > { %v1815_v40 = vpop.f32.mrf.mxu2 }
 0x2c6   : > { %v1863_v13 = vadd.f32 %v1815_v40, %v1583_v48  ;;  %v1969_v19 = vpop.f32.mrf.mxu3 }
 0x2c8   : > { %v2017_v0 = vadd.f32 %v1969_v19, %v1863_v13 }
 0x2c9   : > { %v1541_v47 = vpop.f32.mrf.mxu1 }
 0x2ca   : > { %v2171_v10 = vadd.f32 %v2123_v52, %v2017_v0  ;;  %v1585_v42 = vadd.f32 %v1541_v47, %v3704_v34 }
 0x2cb   : > { %v2126_v59 = vpop.f32.mrf.mxu0 }
 0x2cc   : > { %2204 = vst.msk [vmem:[%s3758_s6 + $0xc0] sm:$0xff] %vm2179_vm2, %v2171_v10 }
 0x2cd   : > { %v1818_v21 = vpop.f32.mrf.mxu2 }
 0x2ce   : > { %v1864_v31 = vadd.f32 %v1818_v21, %v1584_v23  ;;  %v1972_v6 = vpop.f32.mrf.mxu3 }
 0x2d0   : > { %v2018_v14 = vadd.f32 %v1972_v6, %v1864_v31 }
 0x2d1   : > { %v1544_v35 = vpop.f32.mrf.mxu1 }
 0x2d2   : > { %v2172_v26 = vadd.f32 %v2126_v59, %v2018_v14  ;;  %v1586_v50 = vadd.f32 %v1544_v35, %v3712_v33 }
 0x2d3   : > { %v2129_v39 = vpop.f32.mrf.mxu0 }
 0x2d4   : > { %2205 = vst.msk [vmem:[%s3758_s6 + $0xc8] sm:$0xff] %vm2179_vm2, %v2172_v26 }
 0x2d5   : > { %v1821_v62 = vpop.f32.mrf.mxu2 }
 0x2d6   : > { %v1865_v4 = vadd.f32 %v1821_v62, %v1585_v42  ;;  %v1975_v46 = vpop.f32.mrf.mxu3 }
 0x2d8   : > { %v2019_v20 = vadd.f32 %v1975_v46, %v1865_v4 }
 0x2d9   : > { %v1547_v53 = vpop.f32.mrf.mxu1 }
 0x2da   : > { %v2173_v58 = vadd.f32 %v2129_v39, %v2019_v20  ;;  %v1587_v55 = vadd.f32 %v1547_v53, %v3720_v25 }
 0x2db   : > { %v2132_v1 = vpop.f32.mrf.mxu0 }
 0x2dc   : > { %2206 = vst.msk [vmem:[%s3758_s6 + $0xd0] sm:$0xff] %vm2179_vm2, %v2173_v58 }
 0x2dd   : > { %v1824_v11 = vpop.f32.mrf.mxu2 }
 0x2de   : > { %v1866_v60 = vadd.f32 %v1824_v11, %v1586_v50  ;;  %v1978_v17 = vpop.f32.mrf.mxu3 }
 0x2e0   : > { %v2020_v36 = vadd.f32 %v1978_v17, %v1866_v60 }
 0x2e1   : > { %v1550_v61 = vpop.f32.mrf.mxu1 }
 0x2e2   : > { %v2174_v34 = vadd.f32 %v2132_v1, %v2020_v36  ;;  %v1588_v49 = vadd.f32 %v1550_v61, %v3728_v18 }
 0x2e3   : > { %v2135_v9 = vpop.f32.mrf.mxu0 }
 0x2e4   : > { %2207 = vst.msk [vmem:[%s3758_s6 + $0xd8] sm:$0xff] %vm2179_vm2, %v2174_v34 }
 0x2e5   : > { %v1827_v22 = vpop.f32.mrf.mxu2 }
 0x2e6   : > { %v1867_v30 = vadd.f32 %v1827_v22, %v1587_v55  ;;  %v1981_v3 = vpop.f32.mrf.mxu3 }
 0x2e8   : > { %v2021_v51 = vadd.f32 %v1981_v3, %v1867_v30 }
 0x2e9   : > { %v1553_v25 = vpop.f32.mrf.mxu1 }
 0x2ea   : > { %v2175_v33 = vadd.f32 %v2135_v9, %v2021_v51  ;;  %v1589_v5 = vadd.f32 %v1553_v25, %v3736_v57 }
 0x2eb   : > { %v2138_v38 = vpop.f32.mrf.mxu0 }
 0x2ec   : > { %2208 = vst.msk [vmem:[%s3758_s6 + $0xe0] sm:$0xff] %vm2179_vm2, %v2175_v33 }
 0x2ed   : > { %v1830_v32 = vpop.f32.mrf.mxu2 }
 0x2ee   : > { %v1868_v27 = vadd.f32 %v1830_v32, %v1588_v49  ;;  %v1984_v45 = vpop.f32.mrf.mxu3 }
 0x2f0   : > { %v2022_v15 = vadd.f32 %v1984_v45, %v1868_v27 }
 0x2f1   : > { %v1556_v18 = vpop.f32.mrf.mxu1 }
 0x2f2   : > { %v2176_v63 = vadd.f32 %v2138_v38, %v2022_v15  ;;  %v1590_v12 = vadd.f32 %v1556_v18, %v3744_v28 }
 0x2f3   : > { %v2141_v24 = vpop.f32.mrf.mxu0 }
 0x2f4   : > { %2209 = vst.msk [vmem:[%s3758_s6 + $0xe8] sm:$0xff] %vm2179_vm2, %v2176_v63 }
 0x2f5   : > { %v1833_v56 = vpop.f32.mrf.mxu2 }
 0x2f6   : > { %v1869_v41 = vadd.f32 %v1833_v56, %v1589_v5  ;;  %v1987_v16 = vpop.f32.mrf.mxu3 }
 0x2f8   : > { %v2023_v7 = vadd.f32 %v1987_v16, %v1869_v41 }
 0x2fa   : > { %v2177_v8 = vadd.f32 %v2141_v24, %v2023_v7 }
 0x2fb   : > { %v2144_v2 = vpop.f32.mrf.mxu0 }
 0x2fc   : > { %2210 = vst.msk [vmem:[%s3758_s6 + $0xf0] sm:$0xff] %vm2179_vm2, %v2177_v8 }
 0x2fd   : > { %v1836_v57 = vpop.f32.mrf.mxu2 }
 0x2fe   : > { %v1870_v44 = vadd.f32 %v1836_v57, %v1590_v12  ;;  %v1990_v54 = vpop.f32.mrf.mxu3 }
 0x300   : > { %v2024_v43 = vadd.f32 %v1990_v54, %v1870_v44 }
 0x302   : > { %v2178_v29 = vadd.f32 %v2144_v2, %v2024_v43 }
 0x304   : > { %2211 = vst.msk [vmem:[%s3758_s6 + $0xf8] sm:$0xff] %vm2179_vm2, %v2178_v29 }
 0x305   : > { %2773 = shalt.err (!%p2770_p5)
}
 0x306   : > { %s2827_s30 = smov 128   ;;  %s2828_s5 = smov 8  }
 0x307   : > { %2688 = dma.vmem_to_hbm [thread:$0]  (%p2894_p4), %s2229_s13, 4096, %s2231_s14, %s2213_s18, %s2827_s30, %s2827_s30, %s2828_s5  }
 0x308 PF: > { %p2694_p6 = scmp.ge.s32.totalorder %s2824_s20, 2  ;;  %s2245_s6 = sand.u32 1, %s2804_s15  }
 0x309   : > { %s2246_s7 = scalar_lea.sflag [#allocation4], %s2245_s6 }
 0x30a   : > { %p2691_p7 = pnand %p2694_p6, %p2901_p8 }
 0x30c   : > { %p2692_p9 = pneg %p2691_p7 }
 0x30e   : > { %2799 = dma.done.wait (%p2692_p9), %s2246_s7, 4096  }
 0x30f   : > { %2801 = vsyncadd (%p2692_p9), %s2246_s7, 4294963200  ;;  %s17_s20 = sadd.s32 1, %s2824_s20   ;;  %s3996_s15 = smov %s2808_s16 }
 0x310   : > { %p14_p10 = scmp.ge.s32.totalorder %s17_s20, 4   ;;  %s3997_s16 = smov %s2812_s17 }
 0x311   : > { %s3998_s17 = smov %s2907_s28  ;;  %s3999_s18 = smov %s2820_s19 }
 0x312   : > { %s4000_s19 = smov %s4002_s23  ;;  %16 = sbr.rel (!%p14_p10) target bundleno = 4 (0x4), region = 87 }
 0x317   :  { %2252 = vsyncpa [#allocation4], 1 }
 0x318   :  { %2254 = vsyncpa [#allocation4 + $0x1], 1 }

</bundles_post_ra>
